<compile_context>
chip_gen: v6e
topology: v6e:2x2x1
jax: 0.10.0
libtpu: 0.0.40
codegen_flags: <defaults>
</compile_context>

<pallas_src>
import functools

import jax
import jax.numpy as jnp
from jax.experimental import pallas as pl
from jax.experimental.pallas import tpu as pltpu


# --------------------------------------------------------------------------- helpers

def _hswish(x):
    return x * jnp.clip(x + 3.0, 0.0, 6.0) * (1.0 / 6.0)


def _hsigmoid(x):
    return jnp.clip(x + 3.0, 0.0, 6.0) * (1.0 / 6.0)


def _fold_bn(w, bn, eps=1e-5):
    """Fold BN (eval mode) into a conv weight of shape (Cout, ..., kh, kw)."""
    scale = bn['gamma'] / jnp.sqrt(bn['var'] + eps)
    return w * scale[:, None, None, None], bn['beta'] - bn['mean'] * scale


def _reparam_repvgg_dw(p, k, stride, cin, eps=1e-5):
    """(dense kxk dw conv+BN) + (1x1 dw conv+BN) + (identity BN) -> one kxk dw conv."""
    wk, bk = _fold_bn(p['w_dense'], p['bn_dense'], eps)      # (C,1,k,k), (C,)
    w1, b1 = _fold_bn(p['w_1x1'], p['bn_1x1'], eps)          # (C,1,1,1), (C,)
    c = k // 2
    wk = wk.at[:, 0, c, c].add(w1[:, 0, 0, 0])
    bk = bk + b1
    if stride == 1:                                          # identity branch exists
        bn = p['bn_id']
        s = bn['gamma'] / jnp.sqrt(bn['var'] + eps)
        wk = wk.at[:, 0, c, c].add(s)
        bk = bk + bn['beta'] - bn['mean'] * s
    w_kkC = jnp.transpose(wk[:, 0], (1, 2, 0)).reshape(k * k, cin)   # (k*k, C)
    return w_kkC, bk


# --------------------------------------------------------------------------- fused Pallas kernel

def _ds_block_kernel(*refs, k, stride, cin, use_se):
    """Fused: depthwise kxk (stride folded via parity-repacked input) + hardswish
    -> optional SE -> pointwise 1x1 (bf16 MXU) + bias + hardswish."""
    if use_se:
        (x_ref, wdw_ref, bdw_ref, w1_ref, b1_ref, w2_ref, b2_ref,
         wpw_ref, bpw_ref, o_ref, acc_ref) = refs
    else:
        (x_ref, wdw_ref, bdw_ref, wpw_ref, bpw_ref, o_ref, acc_ref) = refs

    _, Ho, Wo, Cout = o_ref.shape
    s = stride
    C = cin

    w_all = wdw_ref[...]                                     # (k*k, C)

    # ---- depthwise accumulation into VMEM scratch (bounds tap live ranges) --
    acc_ref[...] = jnp.zeros_like(acc_ref)
    for dy in range(k):                                      # static unroll
        for dx in range(k):
            py, px = dy % s, dx % s
            by, bx = dy // s, dx // s
            cofs = (py * s + px) * C
            tap = x_ref[:, by:by + Ho, bx:bx + Wo, cofs:cofs + C]   # (1,Ho,Wo,C)
            w_tap = w_all[dy * k + dx:dy * k + dx + 1, :].reshape(1, 1, 1, C)
            acc_ref[...] += tap * w_tap

    h = acc_ref[...] + bdw_ref[...].reshape(1, 1, 1, C)
    h = _hswish(h)                                           # RepVGG act
    h2 = h.reshape(Ho * Wo, C)

    # ---- optional SEModule (global pool -> 1x1 relu -> 1x1 hsigmoid -> scale)
    if use_se:
        m = jnp.mean(h2, axis=0, keepdims=True)              # (1, C)
        a = jnp.dot(m, w1_ref[...], preferred_element_type=jnp.float32) + b1_ref[...]
        a = jnp.maximum(a, 0.0)
        g = jnp.dot(a, w2_ref[...], preferred_element_type=jnp.float32) + b2_ref[...]
        g = _hsigmoid(g)
        h2 = h2 * g                                          # broadcast (1,C)

    # ---- pointwise 1x1 ConvBNLayer on the MXU (bf16 operands, f32 accum) -----
    y = jnp.dot(h2.astype(jnp.bfloat16), wpw_ref[...],
                preferred_element_type=jnp.float32) + bpw_ref[...]
    y = _hswish(y)
    o_ref[...] = y.reshape(1, Ho, Wo, Cout)


def depthwise_separable_forward(x_nchw, kp, *, k, stride, use_se):
    """NCHW input, NCHW output; one fused pallas_call over the batch grid."""
    x = jnp.transpose(x_nchw.astype(jnp.float32), (0, 2, 3, 1))      # NHWC
    N, H, W, C = x.shape
    Cout = kp['b_pw'].shape[1]
    p = (k - 1) // 2
    s = stride
    Ho = (H + 2 * p - k) // s + 1
    Wo = (W + 2 * p - k) // s + 1

    # zero pad + parity repack: x_pad[n, i*s+py, j*s+px, c] ->
    # xr[n, i, j, (py*s+px)*C + c].  Pure rearrangement (1x size), makes every
    # stride-s tap a contiguous slice in-kernel and widens the lane dim to s*s*C.
    Hp, Wp = H + 2 * p, W + 2 * p
    Hp2 = ((Hp + s - 1) // s) * s
    Wp2 = ((Wp + s - 1) // s) * s
    xp = jnp.pad(x, ((0, 0), (p, p + Hp2 - Hp), (p, p + Wp2 - Wp), (0, 0)))
    Hq, Wq = Hp2 // s, Wp2 // s
    xr = (xp.reshape(N, Hq, s, Wq, s, C)
            .transpose(0, 1, 3, 2, 4, 5)
            .reshape(N, Hq, Wq, s * s * C))

    in_arrays = [xr, kp['w_dw'], kp['b_dw']]
    in_specs = [pl.BlockSpec((1, Hq, Wq, s * s * C), lambda n: (n, 0, 0, 0)),
                pl.BlockSpec((k * k, C), lambda n: (0, 0)),
                pl.BlockSpec((1, C), lambda n: (0, 0))]
    if use_se:
        C4 = kp['b1'].shape[1]
        in_arrays += [kp['w1'], kp['b1'], kp['w2'], kp['b2']]
        in_specs += [pl.BlockSpec((C, C4), lambda n: (0, 0)),
                     pl.BlockSpec((1, C4), lambda n: (0, 0)),
                     pl.BlockSpec((C4, C), lambda n: (0, 0)),
                     pl.BlockSpec((1, C), lambda n: (0, 0))]
    in_arrays += [kp['w_pw'], kp['b_pw']]
    in_specs += [pl.BlockSpec((C, Cout), lambda n: (0, 0)),
                 pl.BlockSpec((1, Cout), lambda n: (0, 0))]

    out = pl.pallas_call(
        functools.partial(_ds_block_kernel, k=k, stride=s, cin=C, use_se=use_se),
        out_shape=jax.ShapeDtypeStruct((N, Ho, Wo, Cout), jnp.float32),
        grid=(N,),     # SE needs whole-image pooling -> full spatial block per step
        in_specs=in_specs,
        out_specs=pl.BlockSpec((1, Ho, Wo, Cout), lambda n: (n, 0, 0, 0)),
        scratch_shapes=[pltpu.VMEM((1, Ho, Wo, C), jnp.float32)],
        compiler_params=pltpu.CompilerParams(dimension_semantics=("parallel",)),
    )(*in_arrays)
    return jnp.transpose(out, (0, 3, 1, 2))                          # back to NCHW


# --------------------------------------------------------------------------- parameter prep

def prepare_kernel_params(params, *, k, stride, cin, cout, use_se):
    """Fold BN / reparameterize RepVGG once; lay weights out for the kernel."""
    w_dw, b_dw = _reparam_repvgg_dw(params['dw'], k, stride, cin)
    pw_w, pw_b = _fold_bn(params['pw']['w'], params['pw']['bn'])
    kp = dict(
        w_dw=w_dw,                                                   # (k*k, C) f32
        b_dw=b_dw.reshape(1, cin),
        w_pw=jnp.transpose(pw_w[:, :, 0, 0]).astype(jnp.bfloat16),   # (C, Cout) bf16
        b_pw=pw_b.reshape(1, cout))
    if use_se:
        se = params['se']
        kp['w1'] = jnp.transpose(se['w1'][:, :, 0, 0])               # (C, C/4)
        kp['b1'] = se['b1'].reshape(1, -1)
        kp['w2'] = jnp.transpose(se['w2'][:, :, 0, 0])               # (C/4, C)
        kp['b2'] = se['b2'].reshape(1, cin)
    return kp


class Rng:
    def __init__(self, seed):
        self._key = jax.random.PRNGKey(seed)

    def next(self):
        self._key, sub = jax.random.split(self._key)
        return sub


def _bn_params(rng, c):
    # randomized running stats / affine so the BN fold is actually exercised
    return dict(gamma=1.0 + 0.1 * jax.random.normal(rng.next(), (c,), jnp.float32),
                beta=0.1 * jax.random.normal(rng.next(), (c,), jnp.float32),
                mean=0.1 * jax.random.normal(rng.next(), (c,), jnp.float32),
                var=1.0 + 0.5 * jax.random.uniform(rng.next(), (c,), jnp.float32))


def build_params(rng, *, num_channels, num_filters, stride, dw_size, use_se):
    C, Cout, k = num_channels, num_filters, dw_size
    w = lambda shape: 0.1 * jax.random.normal(rng.next(), shape, jnp.float32)
    p = dict(
        dw=dict(w_dense=w((C, 1, k, k)), bn_dense=_bn_params(rng, C),
                w_1x1=w((C, 1, 1, 1)), bn_1x1=_bn_params(rng, C),
                bn_id=_bn_params(rng, C) if stride == 1 else None),
        pw=dict(w=w((Cout, C, 1, 1)), bn=_bn_params(rng, Cout)))
    if use_se:
        C4 = C // 4
        p['se'] = dict(w1=w((C4, C, 1, 1)),
                       b1=0.01 * jax.random.normal(rng.next(), (C4,), jnp.float32),
                       w2=w((C, C4, 1, 1)),
                       b2=0.01 * jax.random.normal(rng.next(), (C,), jnp.float32))
    return p


# --------------------------------------------------------------------------- pure-JAX reference (unfused, f32) for validation

def reference_forward(x_nchw, params, *, k, stride, use_se, eps=1e-5):
    x = jnp.transpose(x_nchw.astype(jnp.float32), (0, 2, 3, 1))
    N, H, W, C = x.shape
    p = (k - 1) // 2

    def bn(y, b):
        return (y - b['mean']) / jnp.sqrt(b['var'] + eps) * b['gamma'] + b['beta']

    def dwconv(xx, w_oikk, st, pd):
        wt = jnp.transpose(w_oikk[:, 0], (1, 2, 0))[:, :, None, :]   # HWIO, I=1
        return jax.lax.conv_general_dilated(
            xx, wt, (st, st), [(pd, pd), (pd, pd)],
            dimension_numbers=('NHWC', 'HWIO', 'NHWC'), feature_group_count=C)

    dw = params['dw']
    y = bn(dwconv(x, dw['w_dense'], stride, p), dw['bn_dense'])
    y = y + bn(dwconv(x, dw['w_1x1'], stride, 0), dw['bn_1x1'])
    if stride == 1:
        y = y + bn(x, dw['bn_id'])
    y = _hswish(y)
    if use_se:
        se = params['se']
        m = jnp.mean(y, axis=(1, 2))                                 # (N, C)
        a = jnp.maximum(m @ jnp.transpose(se['w1'][:, :, 0, 0]) + se['b1'], 0.0)
        g = _hsigmoid(a @ jnp.transpose(se['w2'][:, :, 0, 0]) + se['b2'])
        y = y * g[:, None, None, :]
    pw = params['pw']
    z = jnp.einsum('nhwc,dc->nhwd', y, pw['w'][:, :, 0, 0])
    z = _hswish(bn(z, pw['bn']))
    return jnp.transpose(z, (0, 3, 1, 2))


# --------------------------------------------------------------------------- main

if __name__ == "__main__":
    rng = Rng(0)
    key = jax.random.PRNGKey(0)

    configs = [
        dict(num_channels=32, num_filters=64, stride=2, dw_size=3, use_se=True),
        dict(num_channels=32, num_filters=64, stride=1, dw_size=5, use_se=False),
    ]

    for i, cfg in enumerate(configs):
        params = build_params(rng, **cfg)
        kp = prepare_kernel_params(params, k=cfg['dw_size'], stride=cfg['stride'],
                                   cin=cfg['num_channels'], cout=cfg['num_filters'],
                                   use_se=cfg['use_se'])
        x = jax.random.normal(jax.random.fold_in(key, i),
                              (2, cfg['num_channels'], 16, 16), jnp.float32)

        fwd = jax.jit(functools.partial(depthwise_separable_forward, kp=kp,
                                        k=cfg['dw_size'], stride=cfg['stride'],
                                        use_se=cfg['use_se']))
        out = jax.block_until_ready(fwd(x))

        p = (cfg['dw_size'] - 1) // 2
        Ho = (16 + 2 * p - cfg['dw_size']) // cfg['stride'] + 1
        assert out.shape == (2, cfg['num_filters'], Ho, Ho), out.shape
        assert bool(jnp.all(jnp.isfinite(out)))

        ref = reference_forward(x, params, k=cfg['dw_size'], stride=cfg['stride'],
                                use_se=cfg['use_se'])
        err = float(jnp.max(jnp.abs(out - ref)))
        assert err < 1e-2, f"config {i}: max abs err {err}"

    print("KERNEL_OK")
</pallas_src>

<mosaic_0001>
module attributes {stable_mosaic.version = 11 : i64} {
  func.func @_ds_block_kernel(%arg0: i32, %arg1: memref<1x9x9x128xf32, #tpu.memory_space<vmem>>, %arg2: memref<9x32xf32, #tpu.memory_space<vmem>>, %arg3: memref<1x32xf32, #tpu.memory_space<vmem>>, %arg4: memref<32x8xf32, #tpu.memory_space<vmem>>, %arg5: memref<1x8xf32, #tpu.memory_space<vmem>>, %arg6: memref<8x32xf32, #tpu.memory_space<vmem>>, %arg7: memref<1x32xf32, #tpu.memory_space<vmem>>, %arg8: memref<32x64xbf16, #tpu.memory_space<vmem>>, %arg9: memref<1x64xf32, #tpu.memory_space<vmem>>, %arg10: memref<1x8x8x64xf32, #tpu.memory_space<vmem>>, %arg11: memref<1x8x8x32xf32, #tpu.memory_space<vmem>>) attributes {dimension_semantics = [#tpu.dimension_semantics<parallel>], iteration_bounds = array<i64: 2>, scalar_prefetch = 0 : i64, scratch_operands = 1 : i64, tpu.core_type = #tpu.core_type<tc>, window_params = [{transform_indices = @transform_0, window_bounds = array<i64: 1, 9, 9, 128>}, {pipeline_mode = #tpu.pipeline_mode<synchronous>, transform_indices = @transform_1, window_bounds = array<i64: 9, 32>}, {pipeline_mode = #tpu.pipeline_mode<synchronous>, transform_indices = @transform_2, window_bounds = array<i64: 1, 32>}, {pipeline_mode = #tpu.pipeline_mode<synchronous>, transform_indices = @transform_3, window_bounds = array<i64: 32, 8>}, {pipeline_mode = #tpu.pipeline_mode<synchronous>, transform_indices = @transform_4, window_bounds = array<i64: 1, 8>}, {pipeline_mode = #tpu.pipeline_mode<synchronous>, transform_indices = @transform_5, window_bounds = array<i64: 8, 32>}, {pipeline_mode = #tpu.pipeline_mode<synchronous>, transform_indices = @transform_6, window_bounds = array<i64: 1, 32>}, {pipeline_mode = #tpu.pipeline_mode<synchronous>, transform_indices = @transform_7, window_bounds = array<i64: 32, 64>}, {pipeline_mode = #tpu.pipeline_mode<synchronous>, transform_indices = @transform_8, window_bounds = array<i64: 1, 64>}, {transform_indices = @transform_9, window_bounds = array<i64: 1, 8, 8, 64>}]} {
    %c0 = arith.constant 0 : index
    %c0_0 = arith.constant 0 : index
    %0 = vector.load %arg2[%c0, %c0_0] : memref<9x32xf32, #tpu.memory_space<vmem>>, vector<9x32xf32>
    %cst = arith.constant 0.000000e+00 : f32
    %1 = vector.broadcast %cst : f32 to vector<1x8x8x32xf32>
    %c0_1 = arith.constant 0 : index
    %c0_2 = arith.constant 0 : index
    %c0_3 = arith.constant 0 : index
    %c0_4 = arith.constant 0 : index
    %2 = vector.load %arg11[%c0_1, %c0_2, %c0_3, %c0_4] : memref<1x8x8x32xf32, #tpu.memory_space<vmem>>, vector<1x8x8x32xf32>
    tpu.vector_store %arg11[%c0_1, %c0_2, %c0_3, %c0_4], %1 {strides = array<i32>} : memref<1x8x8x32xf32, #tpu.memory_space<vmem>>, vector<1x8x8x32xf32>,
    %c0_5 = arith.constant 0 : index
    %c0_6 = arith.constant 0 : index
    %c0_7 = arith.constant 0 : index
    %c0_8 = arith.constant 0 : index
    %3 = vector.load %arg1[%c0_5, %c0_6, %c0_7, %c0_8] : memref<1x9x9x128xf32, #tpu.memory_space<vmem>>, vector<1x8x8x32xf32>
    %4 = vector.extract_strided_slice %0 {offsets = [0, 0], sizes = [1, 32], strides = [1, 1]} : vector<9x32xf32> to vector<1x32xf32>
    %5 = vector.shape_cast %4 : vector<1x32xf32> to vector<1x1x1x32xf32>
    %c0_9 = arith.constant 0 : index
    %c0_10 = arith.constant 0 : index
    %c0_11 = arith.constant 0 : index
    %c0_12 = arith.constant 0 : index
    %6 = vector.load %arg11[%c0_9, %c0_10, %c0_11, %c0_12] : memref<1x8x8x32xf32, #tpu.memory_space<vmem>>, vector<1x8x8x32xf32>
    %7 = vector.broadcast %5 : vector<1x1x1x32xf32> to vector<1x8x8x32xf32>
    %8 = arith.mulf %3, %7 : vector<1x8x8x32xf32>
    %9 = arith.addf %6, %8 : vector<1x8x8x32xf32>
    %c0_13 = arith.constant 0 : index
    %c0_14 = arith.constant 0 : index
    %c0_15 = arith.constant 0 : index
    %c0_16 = arith.constant 0 : index
    %10 = vector.load %arg11[%c0_13, %c0_14, %c0_15, %c0_16] : memref<1x8x8x32xf32, #tpu.memory_space<vmem>>, vector<1x8x8x32xf32>
    tpu.vector_store %arg11[%c0_13, %c0_14, %c0_15, %c0_16], %9 {strides = array<i32>} : memref<1x8x8x32xf32, #tpu.memory_space<vmem>>, vector<1x8x8x32xf32>,
    %c0_17 = arith.constant 0 : index
    %c0_18 = arith.constant 0 : index
    %c0_19 = arith.constant 0 : index
    %c32 = arith.constant 32 : index
    %11 = vector.load %arg1[%c0_17, %c0_18, %c0_19, %c32] : memref<1x9x9x128xf32, #tpu.memory_space<vmem>>, vector<1x8x8x32xf32>
    %12 = vector.extract_strided_slice %0 {offsets = [1, 0], sizes = [1, 32], strides = [1, 1]} : vector<9x32xf32> to vector<1x32xf32>
    %13 = vector.shape_cast %12 : vector<1x32xf32> to vector<1x1x1x32xf32>
    %c0_20 = arith.constant 0 : index
    %c0_21 = arith.constant 0 : index
    %c0_22 = arith.constant 0 : index
    %c0_23 = arith.constant 0 : index
    %14 = vector.load %arg11[%c0_20, %c0_21, %c0_22, %c0_23] : memref<1x8x8x32xf32, #tpu.memory_space<vmem>>, vector<1x8x8x32xf32>
    %15 = vector.broadcast %13 : vector<1x1x1x32xf32> to vector<1x8x8x32xf32>
    %16 = arith.mulf %11, %15 : vector<1x8x8x32xf32>
    %17 = arith.addf %14, %16 : vector<1x8x8x32xf32>
    %c0_24 = arith.constant 0 : index
    %c0_25 = arith.constant 0 : index
    %c0_26 = arith.constant 0 : index
    %c0_27 = arith.constant 0 : index
    %18 = vector.load %arg11[%c0_24, %c0_25, %c0_26, %c0_27] : memref<1x8x8x32xf32, #tpu.memory_space<vmem>>, vector<1x8x8x32xf32>
    tpu.vector_store %arg11[%c0_24, %c0_25, %c0_26, %c0_27], %17 {strides = array<i32>} : memref<1x8x8x32xf32, #tpu.memory_space<vmem>>, vector<1x8x8x32xf32>,
    %c0_28 = arith.constant 0 : index
    %c0_29 = arith.constant 0 : index
    %c1 = arith.constant 1 : index
    %c0_30 = arith.constant 0 : index
    %19 = vector.load %arg1[%c0_28, %c0_29, %c1, %c0_30] : memref<1x9x9x128xf32, #tpu.memory_space<vmem>>, vector<1x8x8x32xf32>
    %20 = vector.extract_strided_slice %0 {offsets = [2, 0], sizes = [1, 32], strides = [1, 1]} : vector<9x32xf32> to vector<1x32xf32>
    %21 = vector.shape_cast %20 : vector<1x32xf32> to vector<1x1x1x32xf32>
    %c0_31 = arith.constant 0 : index
    %c0_32 = arith.constant 0 : index
    %c0_33 = arith.constant 0 : index
    %c0_34 = arith.constant 0 : index
    %22 = vector.load %arg11[%c0_31, %c0_32, %c0_33, %c0_34] : memref<1x8x8x32xf32, #tpu.memory_space<vmem>>, vector<1x8x8x32xf32>
    %23 = vector.broadcast %21 : vector<1x1x1x32xf32> to vector<1x8x8x32xf32>
    %24 = arith.mulf %19, %23 : vector<1x8x8x32xf32>
    %25 = arith.addf %22, %24 : vector<1x8x8x32xf32>
    %c0_35 = arith.constant 0 : index
    %c0_36 = arith.constant 0 : index
    %c0_37 = arith.constant 0 : index
    %c0_38 = arith.constant 0 : index
    %26 = vector.load %arg11[%c0_35, %c0_36, %c0_37, %c0_38] : memref<1x8x8x32xf32, #tpu.memory_space<vmem>>, vector<1x8x8x32xf32>
    tpu.vector_store %arg11[%c0_35, %c0_36, %c0_37, %c0_38], %25 {strides = array<i32>} : memref<1x8x8x32xf32, #tpu.memory_space<vmem>>, vector<1x8x8x32xf32>,
    %c0_39 = arith.constant 0 : index
    %c0_40 = arith.constant 0 : index
    %c0_41 = arith.constant 0 : index
    %c64 = arith.constant 64 : index
    %27 = vector.load %arg1[%c0_39, %c0_40, %c0_41, %c64] : memref<1x9x9x128xf32, #tpu.memory_space<vmem>>, vector<1x8x8x32xf32>
    %28 = vector.extract_strided_slice %0 {offsets = [3, 0], sizes = [1, 32], strides = [1, 1]} : vector<9x32xf32> to vector<1x32xf32>
    %29 = vector.shape_cast %28 : vector<1x32xf32> to vector<1x1x1x32xf32>
    %c0_42 = arith.constant 0 : index
    %c0_43 = arith.constant 0 : index
    %c0_44 = arith.constant 0 : index
    %c0_45 = arith.constant 0 : index
    %30 = vector.load %arg11[%c0_42, %c0_43, %c0_44, %c0_45] : memref<1x8x8x32xf32, #tpu.memory_space<vmem>>, vector<1x8x8x32xf32>
    %31 = vector.broadcast %29 : vector<1x1x1x32xf32> to vector<1x8x8x32xf32>
    %32 = arith.mulf %27, %31 : vector<1x8x8x32xf32>
    %33 = arith.addf %30, %32 : vector<1x8x8x32xf32>
    %c0_46 = arith.constant 0 : index
    %c0_47 = arith.constant 0 : index
    %c0_48 = arith.constant 0 : index
    %c0_49 = arith.constant 0 : index
    %34 = vector.load %arg11[%c0_46, %c0_47, %c0_48, %c0_49] : memref<1x8x8x32xf32, #tpu.memory_space<vmem>>, vector<1x8x8x32xf32>
    tpu.vector_store %arg11[%c0_46, %c0_47, %c0_48, %c0_49], %33 {strides = array<i32>} : memref<1x8x8x32xf32, #tpu.memory_space<vmem>>, vector<1x8x8x32xf32>,
    %c0_50 = arith.constant 0 : index
    %c0_51 = arith.constant 0 : index
    %c0_52 = arith.constant 0 : index
    %c96 = arith.constant 96 : index
    %35 = vector.load %arg1[%c0_50, %c0_51, %c0_52, %c96] : memref<1x9x9x128xf32, #tpu.memory_space<vmem>>, vector<1x8x8x32xf32>
    %36 = vector.extract_strided_slice %0 {offsets = [4, 0], sizes = [1, 32], strides = [1, 1]} : vector<9x32xf32> to vector<1x32xf32>
    %37 = vector.shape_cast %36 : vector<1x32xf32> to vector<1x1x1x32xf32>
    %c0_53 = arith.constant 0 : index
    %c0_54 = arith.constant 0 : index
    %c0_55 = arith.constant 0 : index
    %c0_56 = arith.constant 0 : index
    %38 = vector.load %arg11[%c0_53, %c0_54, %c0_55, %c0_56] : memref<1x8x8x32xf32, #tpu.memory_space<vmem>>, vector<1x8x8x32xf32>
    %39 = vector.broadcast %37 : vector<1x1x1x32xf32> to vector<1x8x8x32xf32>
    %40 = arith.mulf %35, %39 : vector<1x8x8x32xf32>
    %41 = arith.addf %38, %40 : vector<1x8x8x32xf32>
    %c0_57 = arith.constant 0 : index
    %c0_58 = arith.constant 0 : index
    %c0_59 = arith.constant 0 : index
    %c0_60 = arith.constant 0 : index
    %42 = vector.load %arg11[%c0_57, %c0_58, %c0_59, %c0_60] : memref<1x8x8x32xf32, #tpu.memory_space<vmem>>, vector<1x8x8x32xf32>
    tpu.vector_store %arg11[%c0_57, %c0_58, %c0_59, %c0_60], %41 {strides = array<i32>} : memref<1x8x8x32xf32, #tpu.memory_space<vmem>>, vector<1x8x8x32xf32>,
    %c0_61 = arith.constant 0 : index
    %c0_62 = arith.constant 0 : index
    %c1_63 = arith.constant 1 : index
    %c64_64 = arith.constant 64 : index
    %43 = vector.load %arg1[%c0_61, %c0_62, %c1_63, %c64_64] : memref<1x9x9x128xf32, #tpu.memory_space<vmem>>, vector<1x8x8x32xf32>
    %44 = vector.extract_strided_slice %0 {offsets = [5, 0], sizes = [1, 32], strides = [1, 1]} : vector<9x32xf32> to vector<1x32xf32>
    %45 = vector.shape_cast %44 : vector<1x32xf32> to vector<1x1x1x32xf32>
    %c0_65 = arith.constant 0 : index
    %c0_66 = arith.constant 0 : index
    %c0_67 = arith.constant 0 : index
    %c0_68 = arith.constant 0 : index
    %46 = vector.load %arg11[%c0_65, %c0_66, %c0_67, %c0_68] : memref<1x8x8x32xf32, #tpu.memory_space<vmem>>, vector<1x8x8x32xf32>
    %47 = vector.broadcast %45 : vector<1x1x1x32xf32> to vector<1x8x8x32xf32>
    %48 = arith.mulf %43, %47 : vector<1x8x8x32xf32>
    %49 = arith.addf %46, %48 : vector<1x8x8x32xf32>
    %c0_69 = arith.constant 0 : index
    %c0_70 = arith.constant 0 : index
    %c0_71 = arith.constant 0 : index
    %c0_72 = arith.constant 0 : index
    %50 = vector.load %arg11[%c0_69, %c0_70, %c0_71, %c0_72] : memref<1x8x8x32xf32, #tpu.memory_space<vmem>>, vector<1x8x8x32xf32>
    tpu.vector_store %arg11[%c0_69, %c0_70, %c0_71, %c0_72], %49 {strides = array<i32>} : memref<1x8x8x32xf32, #tpu.memory_space<vmem>>, vector<1x8x8x32xf32>,
    %c0_73 = arith.constant 0 : index
    %c1_74 = arith.constant 1 : index
    %c0_75 = arith.constant 0 : index
    %c0_76 = arith.constant 0 : index
    %51 = vector.load %arg1[%c0_73, %c1_74, %c0_75, %c0_76] : memref<1x9x9x128xf32, #tpu.memory_space<vmem>>, vector<1x8x8x32xf32>
    %52 = vector.extract_strided_slice %0 {offsets = [6, 0], sizes = [1, 32], strides = [1, 1]} : vector<9x32xf32> to vector<1x32xf32>
    %53 = vector.shape_cast %52 : vector<1x32xf32> to vector<1x1x1x32xf32>
    %c0_77 = arith.constant 0 : index
    %c0_78 = arith.constant 0 : index
    %c0_79 = arith.constant 0 : index
    %c0_80 = arith.constant 0 : index
    %54 = vector.load %arg11[%c0_77, %c0_78, %c0_79, %c0_80] : memref<1x8x8x32xf32, #tpu.memory_space<vmem>>, vector<1x8x8x32xf32>
    %55 = vector.broadcast %53 : vector<1x1x1x32xf32> to vector<1x8x8x32xf32>
    %56 = arith.mulf %51, %55 : vector<1x8x8x32xf32>
    %57 = arith.addf %54, %56 : vector<1x8x8x32xf32>
    %c0_81 = arith.constant 0 : index
    %c0_82 = arith.constant 0 : index
    %c0_83 = arith.constant 0 : index
    %c0_84 = arith.constant 0 : index
    %58 = vector.load %arg11[%c0_81, %c0_82, %c0_83, %c0_84] : memref<1x8x8x32xf32, #tpu.memory_space<vmem>>, vector<1x8x8x32xf32>
    tpu.vector_store %arg11[%c0_81, %c0_82, %c0_83, %c0_84], %57 {strides = array<i32>} : memref<1x8x8x32xf32, #tpu.memory_space<vmem>>, vector<1x8x8x32xf32>,
    %c0_85 = arith.constant 0 : index
    %c1_86 = arith.constant 1 : index
    %c0_87 = arith.constant 0 : index
    %c32_88 = arith.constant 32 : index
    %59 = vector.load %arg1[%c0_85, %c1_86, %c0_87, %c32_88] : memref<1x9x9x128xf32, #tpu.memory_space<vmem>>, vector<1x8x8x32xf32>
    %60 = vector.extract_strided_slice %0 {offsets = [7, 0], sizes = [1, 32], strides = [1, 1]} : vector<9x32xf32> to vector<1x32xf32>
    %61 = vector.shape_cast %60 : vector<1x32xf32> to vector<1x1x1x32xf32>
    %c0_89 = arith.constant 0 : index
    %c0_90 = arith.constant 0 : index
    %c0_91 = arith.constant 0 : index
    %c0_92 = arith.constant 0 : index
    %62 = vector.load %arg11[%c0_89, %c0_90, %c0_91, %c0_92] : memref<1x8x8x32xf32, #tpu.memory_space<vmem>>, vector<1x8x8x32xf32>
    %63 = vector.broadcast %61 : vector<1x1x1x32xf32> to vector<1x8x8x32xf32>
    %64 = arith.mulf %59, %63 : vector<1x8x8x32xf32>
    %65 = arith.addf %62, %64 : vector<1x8x8x32xf32>
    %c0_93 = arith.constant 0 : index
    %c0_94 = arith.constant 0 : index
    %c0_95 = arith.constant 0 : index
    %c0_96 = arith.constant 0 : index
    %66 = vector.load %arg11[%c0_93, %c0_94, %c0_95, %c0_96] : memref<1x8x8x32xf32, #tpu.memory_space<vmem>>, vector<1x8x8x32xf32>
    tpu.vector_store %arg11[%c0_93, %c0_94, %c0_95, %c0_96], %65 {strides = array<i32>} : memref<1x8x8x32xf32, #tpu.memory_space<vmem>>, vector<1x8x8x32xf32>,
    %c0_97 = arith.constant 0 : index
    %c1_98 = arith.constant 1 : index
    %c1_99 = arith.constant 1 : index
    %c0_100 = arith.constant 0 : index
    %67 = vector.load %arg1[%c0_97, %c1_98, %c1_99, %c0_100] : memref<1x9x9x128xf32, #tpu.memory_space<vmem>>, vector<1x8x8x32xf32>
    %68 = vector.extract_strided_slice %0 {offsets = [8, 0], sizes = [1, 32], strides = [1, 1]} : vector<9x32xf32> to vector<1x32xf32>
    %69 = vector.shape_cast %68 : vector<1x32xf32> to vector<1x1x1x32xf32>
    %c0_101 = arith.constant 0 : index
    %c0_102 = arith.constant 0 : index
    %c0_103 = arith.constant 0 : index
    %c0_104 = arith.constant 0 : index
    %70 = vector.load %arg11[%c0_101, %c0_102, %c0_103, %c0_104] : memref<1x8x8x32xf32, #tpu.memory_space<vmem>>, vector<1x8x8x32xf32>
    %71 = vector.broadcast %69 : vector<1x1x1x32xf32> to vector<1x8x8x32xf32>
    %72 = arith.mulf %67, %71 : vector<1x8x8x32xf32>
    %73 = arith.addf %70, %72 : vector<1x8x8x32xf32>
    %c0_105 = arith.constant 0 : index
    %c0_106 = arith.constant 0 : index
    %c0_107 = arith.constant 0 : index
    %c0_108 = arith.constant 0 : index
    %74 = vector.load %arg11[%c0_105, %c0_106, %c0_107, %c0_108] : memref<1x8x8x32xf32, #tpu.memory_space<vmem>>, vector<1x8x8x32xf32>
    tpu.vector_store %arg11[%c0_105, %c0_106, %c0_107, %c0_108], %73 {strides = array<i32>} : memref<1x8x8x32xf32, #tpu.memory_space<vmem>>, vector<1x8x8x32xf32>,
    %c0_109 = arith.constant 0 : index
    %c0_110 = arith.constant 0 : index
    %c0_111 = arith.constant 0 : index
    %c0_112 = arith.constant 0 : index
    %75 = vector.load %arg11[%c0_109, %c0_110, %c0_111, %c0_112] : memref<1x8x8x32xf32, #tpu.memory_space<vmem>>, vector<1x8x8x32xf32>
    %c0_113 = arith.constant 0 : index
    %c0_114 = arith.constant 0 : index
    %76 = vector.load %arg3[%c0_113, %c0_114] : memref<1x32xf32, #tpu.memory_space<vmem>>, vector<1x32xf32>
    %77 = vector.shape_cast %76 : vector<1x32xf32> to vector<1x1x1x32xf32>
    %78 = vector.broadcast %77 : vector<1x1x1x32xf32> to vector<1x8x8x32xf32>
    %79 = arith.addf %75, %78 : vector<1x8x8x32xf32>
    %cst_115 = arith.constant 3.000000e+00 : f32
    %80 = vector.broadcast %cst_115 : f32 to vector<1x8x8x32xf32>
    %81 = arith.addf %79, %80 : vector<1x8x8x32xf32>
    %cst_116 = arith.constant 0.000000e+00 : f32
    %cst_117 = arith.constant 6.000000e+00 : f32
    %82 = vector.broadcast %cst_116 : f32 to vector<1x8x8x32xf32>
    %83 = arith.maximumf %82, %81 : vector<1x8x8x32xf32>
    %84 = vector.broadcast %cst_117 : f32 to vector<1x8x8x32xf32>
    %85 = arith.minimumf %84, %83 : vector<1x8x8x32xf32>
    %86 = arith.mulf %79, %85 : vector<1x8x8x32xf32>
    %cst_118 = arith.constant 0.166666672 : f32
    %87 = vector.broadcast %cst_118 : f32 to vector<1x8x8x32xf32>
    %88 = arith.mulf %86, %87 : vector<1x8x8x32xf32>
    %89 = vector.shape_cast %88 : vector<1x8x8x32xf32> to vector<64x32xf32>
    %cst_119 = arith.constant dense<0.000000e+00> : vector<32xf32>
    %90 = vector.multi_reduction <add>, %89, %cst_119 [0] : vector<64x32xf32> to vector<32xf32>
    %91 = vector.shape_cast %90 : vector<32xf32> to vector<1x32xf32>
    %cst_120 = arith.constant 6.400000e+01 : f32
    %92 = vector.broadcast %cst_120 : f32 to vector<1x32xf32>
    %93 = arith.divf %91, %92 : vector<1x32xf32>
    %c0_121 = arith.constant 0 : index
    %c0_122 = arith.constant 0 : index
    %94 = vector.load %arg4[%c0_121, %c0_122] : memref<32x8xf32, #tpu.memory_space<vmem>>, vector<32x8xf32>
    %cst_123 = arith.constant dense<0.000000e+00> : vector<1x8xf32>
    %95 = tpu.matmul %93, %94, %cst_123 {dimension_numbers = #tpu.dot_dimension_numbers<[1], [0], [0], [1], [0, 0, 1, 1], [], []>} : vector<1x32xf32>, vector<32x8xf32>, vector<1x8xf32> -> vector<1x8xf32>
    %c0_124 = arith.constant 0 : index
    %c0_125 = arith.constant 0 : index
    %96 = vector.load %arg5[%c0_124, %c0_125] : memref<1x8xf32, #tpu.memory_space<vmem>>, vector<1x8xf32>
    %97 = arith.addf %95, %96 : vector<1x8xf32>
    %cst_126 = arith.constant 0.000000e+00 : f32
    %98 = vector.broadcast %cst_126 : f32 to vector<1x8xf32>
    %99 = arith.maximumf %97, %98 : vector<1x8xf32>
    %c0_127 = arith.constant 0 : index
    %c0_128 = arith.constant 0 : index
    %100 = vector.load %arg6[%c0_127, %c0_128] : memref<8x32xf32, #tpu.memory_space<vmem>>, vector<8x32xf32>
    %cst_129 = arith.constant dense<0.000000e+00> : vector<1x32xf32>
    %101 = tpu.matmul %99, %100, %cst_129 {dimension_numbers = #tpu.dot_dimension_numbers<[1], [0], [0], [1], [0, 0, 1, 1], [], []>} : vector<1x8xf32>, vector<8x32xf32>, vector<1x32xf32> -> vector<1x32xf32>
    %c0_130 = arith.constant 0 : index
    %c0_131 = arith.constant 0 : index
    %102 = vector.load %arg7[%c0_130, %c0_131] : memref<1x32xf32, #tpu.memory_space<vmem>>, vector<1x32xf32>
    %103 = arith.addf %101, %102 : vector<1x32xf32>
    %cst_132 = arith.constant 3.000000e+00 : f32
    %104 = vector.broadcast %cst_132 : f32 to vector<1x32xf32>
    %105 = arith.addf %103, %104 : vector<1x32xf32>
    %cst_133 = arith.constant 0.000000e+00 : f32
    %cst_134 = arith.constant 6.000000e+00 : f32
    %106 = vector.broadcast %cst_133 : f32 to vector<1x32xf32>
    %107 = arith.maximumf %106, %105 : vector<1x32xf32>
    %108 = vector.broadcast %cst_134 : f32 to vector<1x32xf32>
    %109 = arith.minimumf %108, %107 : vector<1x32xf32>
    %cst_135 = arith.constant 0.166666672 : f32
    %110 = vector.broadcast %cst_135 : f32 to vector<1x32xf32>
    %111 = arith.mulf %109, %110 : vector<1x32xf32>
    %112 = vector.broadcast %111 : vector<1x32xf32> to vector<64x32xf32>
    %113 = arith.mulf %89, %112 : vector<64x32xf32>
    %114 = arith.truncf %113 : vector<64x32xf32> to vector<64x32xbf16>
    %c0_136 = arith.constant 0 : index
    %c0_137 = arith.constant 0 : index
    %115 = vector.load %arg8[%c0_136, %c0_137] : memref<32x64xbf16, #tpu.memory_space<vmem>>, vector<32x64xbf16>
    %cst_138 = arith.constant dense<0.000000e+00> : vector<64x64xf32>
    %116 = tpu.matmul %114, %115, %cst_138 {dimension_numbers = #tpu.dot_dimension_numbers<[1], [0], [0], [1], [0, 0, 1, 1], [], []>} : vector<64x32xbf16>, vector<32x64xbf16>, vector<64x64xf32> -> vector<64x64xf32>
    %c0_139 = arith.constant 0 : index
    %c0_140 = arith.constant 0 : index
    %117 = vector.load %arg9[%c0_139, %c0_140] : memref<1x64xf32, #tpu.memory_space<vmem>>, vector<1x64xf32>
    %118 = vector.broadcast %117 : vector<1x64xf32> to vector<64x64xf32>
    %119 = arith.addf %116, %118 : vector<64x64xf32>
    %cst_141 = arith.constant 3.000000e+00 : f32
    %120 = vector.broadcast %cst_141 : f32 to vector<64x64xf32>
    %121 = arith.addf %119, %120 : vector<64x64xf32>
    %cst_142 = arith.constant 0.000000e+00 : f32
    %cst_143 = arith.constant 6.000000e+00 : f32
    %122 = vector.broadcast %cst_142 : f32 to vector<64x64xf32>
    %123 = arith.maximumf %122, %121 : vector<64x64xf32>
    %124 = vector.broadcast %cst_143 : f32 to vector<64x64xf32>
    %125 = arith.minimumf %124, %123 : vector<64x64xf32>
    %126 = arith.mulf %119, %125 : vector<64x64xf32>
    %cst_144 = arith.constant 0.166666672 : f32
    %127 = vector.broadcast %cst_144 : f32 to vector<64x64xf32>
    %128 = arith.mulf %126, %127 : vector<64x64xf32>
    %129 = vector.shape_cast %128 : vector<64x64xf32> to vector<1x8x8x64xf32>
    %c0_145 = arith.constant 0 : index
    %c0_146 = arith.constant 0 : index
    %c0_147 = arith.constant 0 : index
    %c0_148 = arith.constant 0 : index
    %130 = vector.load %arg10[%c0_145, %c0_146, %c0_147, %c0_148] : memref<1x8x8x64xf32, #tpu.memory_space<vmem>>, vector<1x8x8x64xf32>
    tpu.vector_store %arg10[%c0_145, %c0_146, %c0_147, %c0_148], %129 {strides = array<i32>} : memref<1x8x8x64xf32, #tpu.memory_space<vmem>>, vector<1x8x8x64xf32>,
    return
  }
  func.func @transform_0(%arg0: i32) -> (i32, i32, i32, i32) {
    %c0_i32 = arith.constant 0 : i32
    %c0_i32_0 = arith.constant 0 : i32
    %c0_i32_1 = arith.constant 0 : i32
    %c0_i32_2 = arith.constant 0 : i32
    return %arg0, %c0_i32, %c0_i32_0, %c0_i32_1 : i32, i32, i32, i32
  }
  func.func @transform_1(%arg0: i32) -> (i32, i32) {
    %c0_i32 = arith.constant 0 : i32
    %c0_i32_0 = arith.constant 0 : i32
    %c0_i32_1 = arith.constant 0 : i32
    return %c0_i32, %c0_i32_0 : i32, i32
  }
  func.func @transform_2(%arg0: i32) -> (i32, i32) {
    %c0_i32 = arith.constant 0 : i32
    %c0_i32_0 = arith.constant 0 : i32
    %c0_i32_1 = arith.constant 0 : i32
    return %c0_i32, %c0_i32_0 : i32, i32
  }
  func.func @transform_3(%arg0: i32) -> (i32, i32) {
    %c0_i32 = arith.constant 0 : i32
    %c0_i32_0 = arith.constant 0 : i32
    %c0_i32_1 = arith.constant 0 : i32
    return %c0_i32, %c0_i32_0 : i32, i32
  }
  func.func @transform_4(%arg0: i32) -> (i32, i32) {
    %c0_i32 = arith.constant 0 : i32
    %c0_i32_0 = arith.constant 0 : i32
    %c0_i32_1 = arith.constant 0 : i32
    return %c0_i32, %c0_i32_0 : i32, i32
  }
  func.func @transform_5(%arg0: i32) -> (i32, i32) {
    %c0_i32 = arith.constant 0 : i32
    %c0_i32_0 = arith.constant 0 : i32
    %c0_i32_1 = arith.constant 0 : i32
    return %c0_i32, %c0_i32_0 : i32, i32
  }
  func.func @transform_6(%arg0: i32) -> (i32, i32) {
    %c0_i32 = arith.constant 0 : i32
    %c0_i32_0 = arith.constant 0 : i32
    %c0_i32_1 = arith.constant 0 : i32
    return %c0_i32, %c0_i32_0 : i32, i32
  }
  func.func @transform_7(%arg0: i32) -> (i32, i32) {
    %c0_i32 = arith.constant 0 : i32
    %c0_i32_0 = arith.constant 0 : i32
    %c0_i32_1 = arith.constant 0 : i32
    return %c0_i32, %c0_i32_0 : i32, i32
  }
  func.func @transform_8(%arg0: i32) -> (i32, i32) {
    %c0_i32 = arith.constant 0 : i32
    %c0_i32_0 = arith.constant 0 : i32
    %c0_i32_1 = arith.constant 0 : i32
    return %c0_i32, %c0_i32_0 : i32, i32
  }
  func.func @transform_9(%arg0: i32) -> (i32, i32, i32, i32) {
    %c0_i32 = arith.constant 0 : i32
    %c0_i32_0 = arith.constant 0 : i32
    %c0_i32_1 = arith.constant 0 : i32
    %c0_i32_2 = arith.constant 0 : i32
    return %arg0, %c0_i32, %c0_i32_0, %c0_i32_1 : i32, i32, i32, i32
  }
}

</mosaic_0001>

<bundles_post_ra>
// kernel: depthwise_separable_forward.1
= control target key start
LH: loop header
LB: loop body
LE: loop exit
PB: predicated region body
PF: predicated region fallthrough
CT: control target
= control target key end

     0   :  { %14 = vsyncpa [#allocation4], 0  ;;  %s2157_s0 = inlined_call_operand.vmem [shape: f32[2,9,9,128], index: 0, kind: input, shape index: {}]   ;;  %s2158_s1 = inlined_call_operand.vmem [shape: f32[9,32], index: 1, kind: input, shape index: {}]   ;;  %s2159_s2 = inlined_call_operand.vmem [shape: f32[1,32], index: 2, kind: input, shape index: {}]   ;;  %s2160_s3 = inlined_call_operand.vmem [shape: f32[32,8], index: 3, kind: input, shape index: {}]   ;;  %s2161_s4 = inlined_call_operand.vmem [shape: f32[1,8], index: 4, kind: input, shape index: {}]   ;;  %s2162_s5 = inlined_call_operand.vmem [shape: f32[8,32], index: 5, kind: input, shape index: {}]   ;;  %s2163_s6 = inlined_call_operand.vmem [shape: f32[1,32], index: 6, kind: input, shape index: {}]   ;;  %s2164_s7 = inlined_call_operand.vmem [shape: bf16[32,64], index: 7, kind: input, shape index: {}]   ;;  %s2165_s8 = inlined_call_operand.vmem [shape: f32[1,64], index: 8, kind: input, shape index: {}]   ;;  %s2166_s9 = inlined_call_operand.hbm [shape: f32[2,8,8,64], index: 9, kind: output, shape index: {}]  }
   0x1   :  { %16 = vsyncpa [#allocation4 + $0x1], 0  ;;  %s1663_s30 = smov 0   ;;  %s1665_s10 = smov 0  }
   0x2   :  { %s1667_s11 = smov 0   ;;  %s1669_s12 = smov 0  }
   0x3 LB: > { %s1684_s13 = sadd.s32 4294967295, %s1603_s12   ;;  %s1406_s14 = sadd.s32 4294967294, %s1603_s12   ;;  %s1603_s12 = sphi %s1669_s12, %s2172_s12   ;;  %s1599_s11 = sphi %s1667_s11, %s2171_s11   ;;  %s1595_s10 = sphi %s1665_s10, %s2170_s10   ;;  %s1591_s30 = sphi %s1663_s30, %s2169_s30  }
   0x4   : > { %s1688_s15 = sadd.s32 1, %s1603_s12   ;;  %s223_s16 = sadd.s32 1, %s1599_s11 }
   0x5   : > { %s220_s17 = ssub.s32 %s1603_s12, %s1688_s15  ;;  %p233_p0 = scmp.ne.s32.totalorder %s1599_s11, %s1595_s10 }
   0x6   : > { %p221_p1 = scmp.eq.s32.totalorder %s220_s17, 0  ;;  %p234_p2 = scmp.eq.s32.totalorder %s1684_s13, 1 }
   0x7   : > { %p239_p3 = scmp.ne.s32.totalorder %s1595_s10, %s1591_s30  ;;  %p240_p4 = scmp.eq.s32.totalorder %s1406_s14, 1 }
   0x8   : > { %s1699_s18 = scalar_select %p221_p1, %s1599_s11, %s223_s16  }
   0x9   : > { %p1701_p5 = por %p234_p2, %p233_p0  ;;  %p1705_p6 = por %p240_p4, %p239_p3 }
   0xa   : > { %p1409_p7 = scmp.ge.s32.totalorder %s1603_s12, 1  ;;  %p290_p8 = scmp.lt.s32.totalorder %s1603_s12, 3 }
   0xc   : > { %p291_p9 = pnand %p1409_p7, %p290_p8 }
   0xd   : > { %s1605_s23 = smov (!%p291_p9), 32   ;;  %s1606_s24 = smov (!%p291_p9), 96  }
   0xe   : > { %294 = sbr.rel (%p291_p9) target bundleno = 1031 (0x407), region = 56  ;;  %s1607_s25 = smov (!%p291_p9), 64  }
   0xf   : > { %p326_p10 = scmp.lt.s32.totalorder (!%p291_p9), %s1684_s13, 1  ;;  %s1452_s22 = sshll.u32 (!%p291_p9), %s1684_s13, 10 }
  0x10   : > { %s1610_s28 = smov (!%p291_p9), [#allocation3]  }
  0x11   : > { %s1547_s29 = sshll.u32 (!%p291_p9), %s1610_s28, 4  ;;  %s1548_s29 = int_to_ptr.vmem [resolvable:$false] %s1547_s29 }
  0x12   : > { %s1549_s16 = scalar_lea.vmem (!%p291_p9), %s1548_s29, 2048 }
  0x13   : > { %v359_v0 = vlaneseq  ;;  %v1716_v2 = vld [vmem:[%s2158_s1] sm:$0xff]  ;;  %vm334_vm0 = vcmask 261120   ;;  %v1608_v13 = vmov 0.0   ;;  %s327_s26 = scalar_select %p326_p10, %s1684_s13, 1  ;;  %vm1609_vm1 = vmmov 0  }
  0x14   : > { %336 = vst.msk [vmem:[#allocation2 + $0x8] sm:$0xff] %vm334_vm0, %v1608_v13  ;;  %335 = vst.msk [vmem:[#allocation2] sm:$0xff] %vm334_vm0, %v1608_v13  ;;  %1466 = vmatprep.subr.mxu0 %v1608_v13  ;;  %1474 = vmatprep.mubr.msk.f32.mxu0 %vm1609_vm1, %v1608_v13  ;;  %vm1087_vm2 = vcmask 64512   ;;  %vm1321_vm3 = vcmask 523264  }
  0x15   : > { %v1711_v1 = vshrl.u32 %v359_v0, 7  ;;  %337 = vst.msk [vmem:[#allocation2 + $0x10] sm:$0xff] %vm334_vm0, %v1608_v13  ;;  %338 = vst.msk [vmem:[#allocation2 + $0x18] sm:$0xff] %vm334_vm0, %v1608_v13  ;;  %s1494_s27 = smul.u32 144, %s327_s26  ;;  %s2107_s26 = scalar_lea.hbm %s2166_s9, %s1452_s22 }
  0x16   : > { %339 = vst.msk [vmem:[#allocation2 + $0x20] sm:$0xff] %vm334_vm0, %v1608_v13  ;;  %340 = vst.msk [vmem:[#allocation2 + $0x28] sm:$0xff] %vm334_vm0, %v1608_v13 }
  0x17   : > { %v405_v3 = vsub.s32 1, %v1711_v1  ;;  %v529_v4 = vsub.s32 3, %v1711_v1  ;;  %v609_v5 = vsub.s32 4, %v1711_v1  ;;  %v689_v6 = vsub.s32 5, %v1711_v1  ;;  %341 = vst.msk [vmem:[#allocation2 + $0x30] sm:$0xff] %vm334_vm0, %v1608_v13  ;;  %342 = vst.msk [vmem:[#allocation2 + $0x38] sm:$0xff] %vm334_vm0, %v1608_v13  ;;  %s1756_s14 = scalar_lea.vmem %s2157_s0, %s1494_s27 }
  0x18   : > { %v814_v11 = vsub.s32 7, %v1711_v1  ;;  %v361_v14 = vsub.s32 0, %v1711_v1  ;;  %v1762_v16 = vld [vmem:[%s1756_s14 + $0x10] sm:$0xff]  ;;  %v1765_v17 = vld [vmem:[%s1756_s14] sm:$0xff] }
  0x19   : > { %v406_v7 = vrot.slane %v1716_v2, %v405_v3  ;;  %v610_v8 = vrot.slane %v1716_v2, %v609_v5  ;;  %v530_v9 = vrot.slane %v1716_v2, %v529_v4  ;;  %v690_v10 = vrot.slane %v1716_v2, %v689_v6  ;;  %v1770_v24 = vld [vmem:[%s1756_s14 + $0x20] sm:$0xff]  ;;  %v1773_v25 = vld [vmem:[%s1756_s14 + $0x30] sm:$0xff] }
  0x1a   : > { %v815_v12 = vrot.slane %v1716_v2, %v814_v11  ;;  %v362_v15 = vrot.slane %v1716_v2, %v361_v14  ;;  %v1780_v32 = vld [vmem:[%s1756_s14 + $0x40] sm:$0xff]  ;;  %v1783_v33 = vld [vmem:[%s1756_s14 + $0x50] sm:$0xff] }
  0x1b   : > { %408 = vrot.lane.b32.xlu0 %v406_v7, %s1605_s23  ;;  %612 = vrot.lane.b32.xlu1 %v610_v8, %s1606_s24  ;;  %v352_v18 = vld [vmem:[#allocation2 + $0x8] sm:$0xff]  ;;  %v351_v21 = vld [vmem:[#allocation2] sm:$0xff]  ;;  %v1793_v41 = vld [vmem:[%s1756_s14 + $0x70] sm:$0xff] }
  0x1c   : > { %v364_v19 = vmul.f32 %v1762_v16, %v362_v15  ;;  %v363_v20 = vmul.f32 %v1765_v17, %v362_v15  ;;  %v365_v26 = vmul.f32 %v1770_v24, %v362_v15  ;;  %v366_v27 = vmul.f32 %v1773_v25, %v362_v15  ;;  %v353_v28 = vld [vmem:[#allocation2 + $0x10] sm:$0xff]  ;;  %v354_v29 = vld [vmem:[#allocation2 + $0x18] sm:$0xff]  ;;  %v1790_v40 = vld [vmem:[%s1756_s14 + $0x60] sm:$0xff] }
  0x1d   : > { %v367_v34 = vmul.f32 %v1780_v32, %v362_v15  ;;  %v368_v35 = vmul.f32 %v1783_v33, %v362_v15  ;;  %v355_v36 = vld [vmem:[#allocation2 + $0x20] sm:$0xff]  ;;  %v356_v37 = vld [vmem:[#allocation2 + $0x28] sm:$0xff]  ;;  %v369_v42 = vmul.f32 %v1790_v40, %v362_v15  ;;  %v370_v43 = vmul.f32 %v1793_v41, %v362_v15 }
  0x1e   : > { %v372_v22 = vadd.f32 %v364_v19, %v352_v18  ;;  %v371_v23 = vadd.f32 %v363_v20, %v351_v21  ;;  %v373_v30 = vadd.f32 %v365_v26, %v353_v28  ;;  %v374_v31 = vadd.f32 %v366_v27, %v354_v29  ;;  %v357_v44 = vld [vmem:[#allocation2 + $0x30] sm:$0xff]  ;;  %v358_v45 = vld [vmem:[#allocation2 + $0x38] sm:$0xff]  ;;  %v1858_v21 = vld [vmem:[%s1756_s14 + $0x21] sm:$0xff] }
  0x1f   : > { %532 = vrot.lane.b32.xlu0 %v530_v9, %s1607_s25  ;;  %692 = vrot.lane.b32.xlu1 %v690_v10, %s1607_s25  ;;  %v375_v38 = vadd.f32 %v367_v34, %v355_v36  ;;  %v376_v39 = vadd.f32 %v368_v35, %v356_v37  ;;  %v377_v46 = vadd.f32 %v369_v42, %v357_v44  ;;  %v1842_v10 = vld [vmem:[%s1756_s14 + $0x1] sm:$0xff]  ;;  %v1851_v18 = vld [vmem:[%s1756_s14 + $0x11] sm:$0xff] }
  0x20   : > { %380 = vst.msk [vmem:[#allocation2 + $0x8] sm:$0xff] %vm334_vm0, %v372_v22  ;;  %379 = vst.msk [vmem:[#allocation2] sm:$0xff] %vm334_vm0, %v371_v23  ;;  %v378_v47 = vadd.f32 %v370_v43, %v358_v45  ;;  %v1861_v22 = vld [vmem:[%s1756_s14 + $0x31] sm:$0xff]  ;;  %v1868_v27 = vld [vmem:[%s1756_s14 + $0x41] sm:$0xff] }
  0x21   : > { %381 = vst.msk [vmem:[#allocation2 + $0x10] sm:$0xff] %vm334_vm0, %v373_v30  ;;  %382 = vst.msk [vmem:[#allocation2 + $0x18] sm:$0xff] %vm334_vm0, %v374_v31  ;;  %v1871_v28 = vld [vmem:[%s1756_s14 + $0x51] sm:$0xff]  ;;  %v1878_v31 = vld [vmem:[%s1756_s14 + $0x61] sm:$0xff] }
  0x22   : > { %383 = vst.msk [vmem:[#allocation2 + $0x20] sm:$0xff] %vm334_vm0, %v375_v38  ;;  %384 = vst.msk [vmem:[#allocation2 + $0x28] sm:$0xff] %vm334_vm0, %v376_v39  ;;  %v1881_v34 = vld [vmem:[%s1756_s14 + $0x71] sm:$0xff] }
  0x23   : > { %817 = vrot.lane.b32.xlu0 %v815_v12, %s1605_s23  ;;  %385 = vst.msk [vmem:[#allocation2 + $0x30] sm:$0xff] %vm334_vm0, %v377_v46  ;;  %386 = vst.msk [vmem:[#allocation2 + $0x38] sm:$0xff] %vm334_vm0, %v378_v47  ;;  %v1900_v46 = vld [vmem:[%s1756_s14 + $0x80] sm:$0xff] }
  0x8d   : > { %v409_v48 = vpop.permute.xlu0 %408  ;;  %v613_v62 = vpop.permute.xlu1 %612 }
  0x8e   : > { %v412_v49 = vmul.f32 %v409_v48, %v1762_v16  ;;  %v411_v50 = vmul.f32 %v409_v48, %v1765_v17  ;;  %v413_v51 = vmul.f32 %v409_v48, %v1770_v24  ;;  %v414_v52 = vmul.f32 %v409_v48, %v1773_v25 }
  0x8f   : > { %v415_v53 = vmul.f32 %v409_v48, %v1780_v32  ;;  %v416_v54 = vmul.f32 %v409_v48, %v1783_v33  ;;  %v417_v56 = vmul.f32 %v409_v48, %v1790_v40  ;;  %v418_v57 = vmul.f32 %v409_v48, %v1793_v41 }
  0x90   : > { %429 = vrot.lane.b32.xlu1 %v412_v49, %s1606_s24  ;;  %427 = vrot.lane.b32.xlu0 %v411_v50, %s1606_s24  ;;  %v615_v3 = vmul.f32 %v613_v62, %v1765_v17  ;;  %v616_v5 = vmul.f32 %v613_v62, %v1762_v16  ;;  %v617_v7 = vmul.f32 %v613_v62, %v1770_v24  ;;  %v1009_v49 = vld [vmem:[%s2160_s3 + $0x18] sm:$0xff]  ;;  %v1008_v50 = vld [vmem:[%s2160_s3 + $0x10] sm:$0xff] }
  0x91   : > { %v533_v55 = vpop.permute.xlu0 %532  ;;  %v618_v8 = vmul.f32 %v613_v62, %v1773_v25  ;;  %v693_v9 = vpop.permute.xlu1 %692  ;;  %v619_v11 = vmul.f32 %v613_v62, %v1780_v32  ;;  %v620_v12 = vmul.f32 %v613_v62, %v1783_v33  ;;  %v622_v20 = vmul.f32 %v613_v62, %v1793_v41  ;;  %1467 = vmatpush3.msra.mxu0 %v1009_v49 }
  0x92   : > { %v535_v58 = vmul.f32 %v533_v55, %v1765_v17  ;;  %v536_v59 = vmul.f32 %v533_v55, %v1762_v16  ;;  %v537_v60 = vmul.f32 %v533_v55, %v1770_v24  ;;  %v538_v61 = vmul.f32 %v533_v55, %v1773_v25  ;;  %1468 = vmatprep.subr.mxu0 %v1608_v13 }
  0x93   : > { %v539_v63 = vmul.f32 %v533_v55, %v1780_v32  ;;  %v540_v0 = vmul.f32 %v533_v55, %v1783_v33  ;;  %v541_v4 = vmul.f32 %v533_v55, %v1790_v40  ;;  %v542_v6 = vmul.f32 %v533_v55, %v1793_v41  ;;  %1469 = vmatpush3.msra.mxu0 %v1008_v50 }
  0x94   : > { %431 = vrot.lane.b32.xlu1 %v413_v51, %s1606_s24  ;;  %433 = vrot.lane.b32.xlu0 %v414_v52, %s1606_s24  ;;  %v695_v15 = vmul.f32 %v693_v9, %v1842_v10  ;;  %v621_v17 = vmul.f32 %v613_v62, %v1790_v40  ;;  %v696_v19 = vmul.f32 %v693_v9, %v1851_v18  ;;  %v1007_v51 = vld [vmem:[%s2160_s3 + $0x8] sm:$0xff]  ;;  %v1006_v52 = vld [vmem:[%s2160_s3] sm:$0xff]  ;;  %v485_v55 = vsub.s32 2, %v1711_v1 }
  0x95   : > { %v697_v23 = vmul.f32 %v693_v9, %v1858_v21  ;;  %v698_v26 = vmul.f32 %v693_v9, %v1861_v22  ;;  %v699_v29 = vmul.f32 %v693_v9, %v1868_v27  ;;  %v700_v30 = vmul.f32 %v693_v9, %v1871_v28  ;;  %v818_v35 = vpop.permute.xlu0 %817  ;;  %1470 = vmatprep.subr.mxu0 %v1608_v13 }
  0x96   : > { %v701_v36 = vmul.f32 %v693_v9, %v1878_v31  ;;  %v702_v37 = vmul.f32 %v693_v9, %v1881_v34  ;;  %v820_v38 = vmul.f32 %v818_v35, %v1762_v16  ;;  %v821_v39 = vmul.f32 %v818_v35, %v1770_v24  ;;  %1471 = vmatpush3.msra.mxu0 %v1007_v51 }
  0x97   : > { %v822_v42 = vmul.f32 %v818_v35, %v1773_v25  ;;  %v823_v43 = vmul.f32 %v818_v35, %v1780_v32  ;;  %v824_v44 = vmul.f32 %v818_v35, %v1783_v33  ;;  %v825_v45 = vmul.f32 %v818_v35, %v1790_v40  ;;  %1472 = vmatprep.subr.mxu0 %v1608_v13 }
  0x98   : > { %435 = vrot.lane.b32.xlu1 %v415_v53, %s1606_s24  ;;  %437 = vrot.lane.b32.xlu0 %v416_v54, %s1606_s24  ;;  %v826_v47 = vmul.f32 %v818_v35, %v1793_v41  ;;  %v827_v48 = vmul.f32 %v1900_v46, %v818_v35  ;;  %v396_v53 = vld [vmem:[#allocation2 + $0x8] sm:$0xff]  ;;  %v395_v54 = vld [vmem:[#allocation2] sm:$0xff]  ;;  %v486_v62 = vrot.slane %v1716_v2, %v485_v55 }
  0x99   : > { %1473 = vmatpush3.msra.mxu0 %v1006_v52 }
  0x9a   : > { %1477 = vmatprep.subr.mxu0 %v1608_v13  ;;  %v494_v55 = vmul.f32 %v1881_v34, %v486_v62 }
  0x9c   : > { %439 = vrot.lane.b32.xlu1 %v417_v56, %s1606_s24  ;;  %441 = vrot.lane.b32.xlu0 %v418_v57, %s1606_s24 }
  0xa0   : > { %551 = vrot.lane.b32.xlu1 %v535_v58, %s1607_s25  ;;  %553 = vrot.lane.b32.xlu0 %v536_v59, %s1607_s25 }
  0xa4   : > { %555 = vrot.lane.b32.xlu1 %v537_v60, %s1607_s25  ;;  %557 = vrot.lane.b32.xlu0 %v538_v61, %s1607_s25  ;;  %v397_v60 = vld [vmem:[#allocation2 + $0x10] sm:$0xff]  ;;  %v398_v61 = vld [vmem:[#allocation2 + $0x18] sm:$0xff] }
  0xa8   : > { %559 = vrot.lane.b32.xlu1 %v539_v63, %s1607_s25  ;;  %561 = vrot.lane.b32.xlu0 %v540_v0, %s1607_s25 }
  0xac   : > { %563 = vrot.lane.b32.xlu1 %v541_v4, %s1607_s25  ;;  %631 = vrot.lane.b32.xlu0 %v615_v3, %s1605_s23 }
  0xb0   : > { %633 = vrot.lane.b32.xlu1 %v616_v5, %s1605_s23  ;;  %565 = vrot.lane.b32.xlu0 %v542_v6, %s1607_s25  ;;  %v399_v5 = vld [vmem:[#allocation2 + $0x20] sm:$0xff]  ;;  %v400_v6 = vld [vmem:[#allocation2 + $0x28] sm:$0xff] }
  0xb4   : > { %635 = vrot.lane.b32.xlu1 %v617_v7, %s1605_s23  ;;  %637 = vrot.lane.b32.xlu0 %v618_v8, %s1605_s23  ;;  %v487_v7 = vmul.f32 %v1842_v10, %v486_v62  ;;  %v488_v8 = vmul.f32 %v1851_v18, %v486_v62  ;;  %v490_v10 = vmul.f32 %v1861_v22, %v486_v62 }
  0xb8   : > { %639 = vrot.lane.b32.xlu1 %v619_v11, %s1605_s23  ;;  %641 = vrot.lane.b32.xlu0 %v620_v12, %s1605_s23 }
  0xbc   : > { %643 = vrot.lane.b32.xlu1 %v621_v17, %s1605_s23  ;;  %711 = vrot.lane.b32.xlu0 %v695_v15, %s1607_s25  ;;  %v401_v17 = vld [vmem:[#allocation2 + $0x30] sm:$0xff] }
  0xc0   : > { %713 = vrot.lane.b32.xlu1 %v696_v19, %s1607_s25  ;;  %645 = vrot.lane.b32.xlu0 %v622_v20, %s1605_s23  ;;  %v402_v19 = vld [vmem:[#allocation2 + $0x38] sm:$0xff] }
  0xc4   : > { %715 = vrot.lane.b32.xlu1 %v697_v23, %s1607_s25  ;;  %717 = vrot.lane.b32.xlu0 %v698_v26, %s1607_s25 }
  0xc8   : > { %719 = vrot.lane.b32.xlu1 %v699_v29, %s1607_s25  ;;  %721 = vrot.lane.b32.xlu0 %v700_v30, %s1607_s25  ;;  %v489_v30 = vmul.f32 %v1858_v21, %v486_v62 }
  0xcc   : > { %723 = vrot.lane.b32.xlu1 %v701_v36, %s1607_s25  ;;  %725 = vrot.lane.b32.xlu0 %v702_v37, %s1607_s25 }
  0xd0   : > { %836 = vrot.lane.b32.xlu1 %v820_v38, %s1606_s24  ;;  %838 = vrot.lane.b32.xlu0 %v821_v39, %s1606_s24 }
  0xd4   : > { %840 = vrot.lane.b32.xlu1 %v822_v42, %s1606_s24  ;;  %842 = vrot.lane.b32.xlu0 %v823_v43, %s1606_s24 }
  0xd8   : > { %844 = vrot.lane.b32.xlu1 %v824_v44, %s1606_s24  ;;  %846 = vrot.lane.b32.xlu0 %v825_v45, %s1606_s24  ;;  %v491_v45 = vmul.f32 %v1868_v27, %v486_v62 }
  0xdc   : > { %848 = vrot.lane.b32.xlu1 %v826_v47, %s1606_s24  ;;  %850 = vrot.lane.b32.xlu0 %v827_v48, %s1606_s24  ;;  %v492_v47 = vmul.f32 %v1871_v28, %v486_v62 }
 0x102   : > { %v430_v56 = vpop.permute.xlu1 %429  ;;  %v428_v57 = vpop.permute.xlu0 %427 }
 0x103   : > { %v452_v58 = vadd.f32 %v430_v56, %v396_v53  ;;  %v451_v59 = vadd.f32 %v428_v57, %v395_v54  ;;  %v493_v54 = vmul.f32 %v1878_v31, %v486_v62 }
 0x105   : > { %460 = vst.msk [vmem:[#allocation2 + $0x8] sm:$0xff] %vm334_vm0, %v452_v58  ;;  %459 = vst.msk [vmem:[#allocation2] sm:$0xff] %vm334_vm0, %v451_v59 }
 0x106   : > { %v432_v63 = vpop.permute.xlu1 %431  ;;  %v434_v0 = vpop.permute.xlu0 %433 }
 0x107   : > { %v453_v3 = vadd.f32 %v432_v63, %v397_v60  ;;  %v454_v4 = vadd.f32 %v434_v0, %v398_v61 }
 0x109   : > { %461 = vst.msk [vmem:[#allocation2 + $0x10] sm:$0xff] %vm334_vm0, %v453_v3  ;;  %462 = vst.msk [vmem:[#allocation2 + $0x18] sm:$0xff] %vm334_vm0, %v454_v4 }
 0x10a   : > { %v436_v9 = vpop.permute.xlu1 %435  ;;  %v438_v11 = vpop.permute.xlu0 %437 }
 0x10b   : > { %v455_v12 = vadd.f32 %v436_v9, %v399_v5  ;;  %v456_v15 = vadd.f32 %v438_v11, %v400_v6 }
 0x10c   : > { %v475_v20 = vld [vmem:[#allocation2] sm:$0xff]  ;;  %v476_v23 = vld [vmem:[#allocation2 + $0x8] sm:$0xff] }
 0x10d   : > { %463 = vst.msk [vmem:[#allocation2 + $0x20] sm:$0xff] %vm334_vm0, %v455_v12  ;;  %464 = vst.msk [vmem:[#allocation2 + $0x28] sm:$0xff] %vm334_vm0, %v456_v15  ;;  %v495_v26 = vadd.f32 %v487_v7, %v475_v20  ;;  %v496_v29 = vadd.f32 %v488_v8, %v476_v23 }
 0x10e   : > { %v440_v35 = vpop.permute.xlu1 %439  ;;  %v442_v36 = vpop.permute.xlu0 %441 }
 0x10f   : > { %v457_v37 = vadd.f32 %v440_v35, %v401_v17  ;;  %v458_v38 = vadd.f32 %v442_v36, %v402_v19  ;;  %503 = vst.msk [vmem:[#allocation2] sm:$0xff] %vm334_vm0, %v495_v26  ;;  %504 = vst.msk [vmem:[#allocation2 + $0x8] sm:$0xff] %vm334_vm0, %v496_v29 }
 0x110   : > { %v477_v39 = vld [vmem:[#allocation2 + $0x10] sm:$0xff]  ;;  %v478_v42 = vld [vmem:[#allocation2 + $0x18] sm:$0xff] }
 0x111   : > { %465 = vst.msk [vmem:[#allocation2 + $0x30] sm:$0xff] %vm334_vm0, %v457_v37  ;;  %466 = vst.msk [vmem:[#allocation2 + $0x38] sm:$0xff] %vm334_vm0, %v458_v38  ;;  %v497_v43 = vadd.f32 %v489_v30, %v477_v39  ;;  %v498_v44 = vadd.f32 %v490_v10, %v478_v42 }
 0x112   : > { %v552_v48 = vpop.permute.xlu1 %551  ;;  %v554_v49 = vpop.permute.xlu0 %553 }
 0x113   : > { %505 = vst.msk [vmem:[#allocation2 + $0x10] sm:$0xff] %vm334_vm0, %v497_v43  ;;  %506 = vst.msk [vmem:[#allocation2 + $0x18] sm:$0xff] %vm334_vm0, %v498_v44 }
 0x114   : > { %v479_v50 = vld [vmem:[#allocation2 + $0x20] sm:$0xff]  ;;  %v480_v51 = vld [vmem:[#allocation2 + $0x28] sm:$0xff] }
 0x115   : > { %v499_v52 = vadd.f32 %v491_v45, %v479_v50  ;;  %v500_v53 = vadd.f32 %v492_v47, %v480_v51 }
 0x116   : > { %v519_v56 = vld [vmem:[#allocation2] sm:$0xff]  ;;  %v520_v57 = vld [vmem:[#allocation2 + $0x8] sm:$0xff]  ;;  %v556_v58 = vpop.permute.xlu1 %555  ;;  %v558_v59 = vpop.permute.xlu0 %557 }
 0x117   : > { %v575_v60 = vadd.f32 %v552_v48, %v519_v56  ;;  %v576_v61 = vadd.f32 %v554_v49, %v520_v57  ;;  %507 = vst.msk [vmem:[#allocation2 + $0x20] sm:$0xff] %vm334_vm0, %v499_v52  ;;  %508 = vst.msk [vmem:[#allocation2 + $0x28] sm:$0xff] %vm334_vm0, %v500_v53 }
 0x118   : > { %v481_v63 = vld [vmem:[#allocation2 + $0x30] sm:$0xff]  ;;  %v482_v0 = vld [vmem:[#allocation2 + $0x38] sm:$0xff] }
 0x119   : > { %583 = vst.msk [vmem:[#allocation2] sm:$0xff] %vm334_vm0, %v575_v60  ;;  %584 = vst.msk [vmem:[#allocation2 + $0x8] sm:$0xff] %vm334_vm0, %v576_v61  ;;  %v501_v3 = vadd.f32 %v493_v54, %v481_v63  ;;  %v502_v4 = vadd.f32 %v494_v55, %v482_v0  ;;  %v770_v55 = vsub.s32 6, %v1711_v1 }
 0x11a   : > { %v521_v5 = vld [vmem:[#allocation2 + $0x10] sm:$0xff]  ;;  %v522_v62 = vld [vmem:[#allocation2 + $0x18] sm:$0xff]  ;;  %v560_v6 = vpop.permute.xlu1 %559  ;;  %v562_v7 = vpop.permute.xlu0 %561 }
 0x11b   : > { %v577_v8 = vadd.f32 %v556_v58, %v521_v5  ;;  %v578_v9 = vadd.f32 %v558_v59, %v522_v62  ;;  %509 = vst.msk [vmem:[#allocation2 + $0x30] sm:$0xff] %vm334_vm0, %v501_v3  ;;  %510 = vst.msk [vmem:[#allocation2 + $0x38] sm:$0xff] %vm334_vm0, %v502_v4  ;;  %v771_v63 = vrot.slane %v1716_v2, %v770_v55 }
 0x11d   : > { %585 = vst.msk [vmem:[#allocation2 + $0x10] sm:$0xff] %vm334_vm0, %v577_v8  ;;  %586 = vst.msk [vmem:[#allocation2 + $0x18] sm:$0xff] %vm334_vm0, %v578_v9 }
 0x11e   : > { %v523_v11 = vld [vmem:[#allocation2 + $0x20] sm:$0xff]  ;;  %v524_v12 = vld [vmem:[#allocation2 + $0x28] sm:$0xff]  ;;  %v564_v15 = vpop.permute.xlu1 %563  ;;  %v632_v17 = vpop.permute.xlu0 %631 }
 0x11f   : > { %v579_v19 = vadd.f32 %v560_v6, %v523_v11  ;;  %v580_v20 = vadd.f32 %v562_v7, %v524_v12  ;;  %v772_v7 = vmul.f32 %v771_v63, %v1762_v16 }
 0x120   : > { %v599_v23 = vld [vmem:[#allocation2] sm:$0xff]  ;;  %v600_v10 = vld [vmem:[#allocation2 + $0x8] sm:$0xff] }
 0x121   : > { %587 = vst.msk [vmem:[#allocation2 + $0x20] sm:$0xff] %vm334_vm0, %v579_v19  ;;  %588 = vst.msk [vmem:[#allocation2 + $0x28] sm:$0xff] %vm334_vm0, %v580_v20  ;;  %v655_v26 = vadd.f32 %v632_v17, %v599_v23  ;;  %v773_v20 = vmul.f32 %v771_v63, %v1770_v24 }
 0x122   : > { %v525_v29 = vld [vmem:[#allocation2 + $0x30] sm:$0xff]  ;;  %v634_v30 = vpop.permute.xlu1 %633  ;;  %v566_v35 = vpop.permute.xlu0 %565  ;;  %v526_v36 = vld [vmem:[#allocation2 + $0x38] sm:$0xff] }
 0x123   : > { %v581_v37 = vadd.f32 %v564_v15, %v525_v29  ;;  %663 = vst.msk [vmem:[#allocation2] sm:$0xff] %vm334_vm0, %v655_v26  ;;  %v656_v38 = vadd.f32 %v634_v30, %v600_v10  ;;  %v582_v39 = vadd.f32 %v566_v35, %v526_v36 }
 0x124   : > { %v601_v43 = vld [vmem:[#allocation2 + $0x10] sm:$0xff]  ;;  %v602_v45 = vld [vmem:[#allocation2 + $0x18] sm:$0xff] }
 0x125   : > { %589 = vst.msk [vmem:[#allocation2 + $0x30] sm:$0xff] %vm334_vm0, %v581_v37  ;;  %664 = vst.msk [vmem:[#allocation2 + $0x8] sm:$0xff] %vm334_vm0, %v656_v38  ;;  %v774_v37 = vmul.f32 %v771_v63, %v1773_v25  ;;  %v775_v38 = vmul.f32 %v771_v63, %v1780_v32  ;;  %v776_v25 = vmul.f32 %v771_v63, %v1783_v33 }
 0x126   : > { %590 = vst.msk [vmem:[#allocation2 + $0x38] sm:$0xff] %vm334_vm0, %v582_v39  ;;  %v636_v42 = vpop.permute.xlu1 %635  ;;  %v638_v44 = vpop.permute.xlu0 %637  ;;  %v777_v32 = vmul.f32 %v771_v63, %v1790_v40  ;;  %v779_v33 = vmul.f32 %v1900_v46, %v771_v63  ;;  %v1994_v40 = vld [vmem:[%s2158_s1 + $0x8] ss:$0 sm:$0xff] }
 0x127   : > { %v657_v47 = vadd.f32 %v636_v42, %v601_v43  ;;  %v658_v48 = vadd.f32 %v638_v44, %v602_v45 }
 0x128   : > { %v603_v50 = vld [vmem:[#allocation2 + $0x20] sm:$0xff]  ;;  %v604_v52 = vld [vmem:[#allocation2 + $0x28] sm:$0xff] }
 0x129   : > { %665 = vst.msk [vmem:[#allocation2 + $0x10] sm:$0xff] %vm334_vm0, %v657_v47  ;;  %666 = vst.msk [vmem:[#allocation2 + $0x18] sm:$0xff] %vm334_vm0, %v658_v48 }
 0x12a   : > { %v640_v49 = vpop.permute.xlu1 %639  ;;  %v642_v51 = vpop.permute.xlu0 %641  ;;  %v679_v59 = vld [vmem:[#allocation2] sm:$0xff] }
 0x12b   : > { %v659_v53 = vadd.f32 %v640_v49, %v603_v50  ;;  %v660_v54 = vadd.f32 %v642_v51, %v604_v52 }
 0x12c   : > { %v605_v57 = vld [vmem:[#allocation2 + $0x30] sm:$0xff]  ;;  %v680_v3 = vld [vmem:[#allocation2 + $0x8] sm:$0xff] }
 0x12d   : > { %667 = vst.msk [vmem:[#allocation2 + $0x20] sm:$0xff] %vm334_vm0, %v659_v53  ;;  %668 = vst.msk [vmem:[#allocation2 + $0x28] sm:$0xff] %vm334_vm0, %v660_v54  ;;  %v606_v5 = vld [vmem:[#allocation2 + $0x38] sm:$0xff] }
 0x12e   : > { %v644_v56 = vpop.permute.xlu1 %643  ;;  %v712_v58 = vpop.permute.xlu0 %711 }
 0x12f   : > { %v661_v60 = vadd.f32 %v644_v56, %v605_v57  ;;  %v735_v61 = vadd.f32 %v712_v58, %v679_v59  ;;  %v778_v59 = vmul.f32 %v771_v63, %v1793_v41  ;;  %v896_v41 = vmul.f32 %v1994_v40, %v1851_v18 }
 0x130   : > { %v681_v9 = vld [vmem:[#allocation2 + $0x10] sm:$0xff]  ;;  %v682_v12 = vld [vmem:[#allocation2 + $0x18] sm:$0xff] }
 0x131   : > { %669 = vst.msk [vmem:[#allocation2 + $0x30] sm:$0xff] %vm334_vm0, %v661_v60  ;;  %743 = vst.msk [vmem:[#allocation2] sm:$0xff] %vm334_vm0, %v735_v61 }
 0x132   : > { %v714_v0 = vpop.permute.xlu1 %713  ;;  %v646_v4 = vpop.permute.xlu0 %645 }
 0x133   : > { %v736_v62 = vadd.f32 %v714_v0, %v680_v3  ;;  %v662_v6 = vadd.f32 %v646_v4, %v606_v5 }
 0x134   : > { %v683_v26 = vld [vmem:[#allocation2 + $0x20] sm:$0xff]  ;;  %v684_v30 = vld [vmem:[#allocation2 + $0x28] sm:$0xff] }
 0x135   : > { %744 = vst.msk [vmem:[#allocation2 + $0x8] sm:$0xff] %vm334_vm0, %v736_v62  ;;  %670 = vst.msk [vmem:[#allocation2 + $0x38] sm:$0xff] %vm334_vm0, %v662_v6 }
 0x136   : > { %v716_v8 = vpop.permute.xlu1 %715  ;;  %v718_v11 = vpop.permute.xlu0 %717 }
 0x137   : > { %v737_v15 = vadd.f32 %v716_v8, %v681_v9  ;;  %v738_v17 = vadd.f32 %v718_v11, %v682_v12 }
 0x138   : > { %v760_v19 = vld [vmem:[#allocation2] sm:$0xff]  ;;  %v685_v24 = vld [vmem:[#allocation2 + $0x30] sm:$0xff] }
 0x139   : > { %745 = vst.msk [vmem:[#allocation2 + $0x10] sm:$0xff] %vm334_vm0, %v737_v15  ;;  %746 = vst.msk [vmem:[#allocation2 + $0x18] sm:$0xff] %vm334_vm0, %v738_v17  ;;  %v780_v2 = vadd.f32 %v772_v7, %v760_v19  ;;  %v897_v17 = vmul.f32 %v1994_v40, %v1858_v21 }
 0x13a   : > { %v720_v23 = vpop.permute.xlu1 %719  ;;  %v722_v29 = vpop.permute.xlu0 %721 }
 0x13b   : > { %v739_v10 = vadd.f32 %v720_v23, %v683_v26  ;;  %v740_v16 = vadd.f32 %v722_v29, %v684_v30  ;;  %788 = vst.msk [vmem:[#allocation2] sm:$0xff] %vm334_vm0, %v780_v2  ;;  %v898_v29 = vmul.f32 %v1994_v40, %v1861_v22  ;;  %v899_v30 = vmul.f32 %v1994_v40, %v1868_v27  ;;  %v1437_v22 = vld [vmem:[%s2159_s2] ss:$0 sm:$0xff] }
 0x13c   : > { %v761_v35 = vld [vmem:[#allocation2 + $0x8] sm:$0xff]  ;;  %v686_v43 = vld [vmem:[#allocation2 + $0x38] sm:$0xff] }
 0x13d   : > { %747 = vst.msk [vmem:[#allocation2 + $0x20] sm:$0xff] %vm334_vm0, %v739_v10  ;;  %748 = vst.msk [vmem:[#allocation2 + $0x28] sm:$0xff] %vm334_vm0, %v740_v16  ;;  %v781_v36 = vadd.f32 %v773_v20, %v761_v35 }
 0x13e   : > { %v724_v39 = vpop.permute.xlu1 %723  ;;  %v726_v42 = vpop.permute.xlu0 %725 }
 0x13f   : > { %v741_v44 = vadd.f32 %v724_v39, %v685_v24  ;;  %v742_v45 = vadd.f32 %v726_v42, %v686_v43  ;;  %789 = vst.msk [vmem:[#allocation2 + $0x8] sm:$0xff] %vm334_vm0, %v781_v36  ;;  %v900_v42 = vmul.f32 %v1994_v40, %v1871_v28  ;;  %v901_v43 = vmul.f32 %v1994_v40, %v1878_v31 }
 0x140   : > { %v762_v47 = vld [vmem:[#allocation2 + $0x10] sm:$0xff]  ;;  %v763_v48 = vld [vmem:[#allocation2 + $0x18] sm:$0xff] }
 0x141   : > { %749 = vst.msk [vmem:[#allocation2 + $0x30] sm:$0xff] %vm334_vm0, %v741_v44  ;;  %750 = vst.msk [vmem:[#allocation2 + $0x38] sm:$0xff] %vm334_vm0, %v742_v45  ;;  %v782_v49 = vadd.f32 %v774_v37, %v762_v47  ;;  %v783_v50 = vadd.f32 %v775_v38, %v763_v48  ;;  %v1435_v44 = vld [vmem:[%s1756_s14 + $0x81] sm:$0xff]  ;;  %s323_s14 = sand.u32 1, %s1595_s10  }
 0x142   : > { %v837_v51 = vpop.permute.xlu1 %836  ;;  %v804_v52 = vld [vmem:[#allocation2] sm:$0xff]  ;;  %v839_v53 = vpop.permute.xlu0 %838  ;;  %v903_v31 = vmul.f32 %v1994_v40, %v1435_v44  ;;  %s1410_s17 = sshll.u32 %s323_s14, 6  ;;  %s2117_s13 = scalar_lea.sflag [#allocation4], %s323_s14 }
 0x143   : > { %v860_v54 = vadd.f32 %v837_v51, %v804_v52  ;;  %790 = vst.msk [vmem:[#allocation2 + $0x10] sm:$0xff] %vm334_vm0, %v782_v49  ;;  %791 = vst.msk [vmem:[#allocation2 + $0x18] sm:$0xff] %vm334_vm0, %v783_v50  ;;  %v902_v50 = vmul.f32 %v1994_v40, %v1881_v34  ;;  %s2088_s21 = scalar_lea.vmem [#allocation3], %s1410_s17 }
 0x144   : > { %v764_v55 = vld [vmem:[#allocation2 + $0x20] sm:$0xff]  ;;  %v765_v56 = vld [vmem:[#allocation2 + $0x28] sm:$0xff]  ;;  %s1344_s23 = sshll.u32 %s2088_s21, 4  ;;  %s2109_s23 = int_to_ptr.vmem [resolvable:$true] %s1344_s23 }
 0x145   : > { %868 = vst.msk [vmem:[#allocation2] sm:$0xff] %vm334_vm0, %v860_v54  ;;  %v784_v57 = vadd.f32 %v776_v25, %v764_v55  ;;  %v785_v58 = vadd.f32 %v777_v32, %v765_v56  ;;  %s1543_s27 = scalar_lea.vmem %s2109_s23, 1024  ;;  %p1550_p0 = scmp.lt.s32.totalorder %s2109_s23, %s1548_s29 }
 0x146   : > { %v805_v60 = vld [vmem:[#allocation2 + $0x8] sm:$0xff]  ;;  %v841_v61 = vpop.permute.xlu1 %840  ;;  %v843_v0 = vpop.permute.xlu0 %842  ;;  %p1544_p11 = scmp.ne.s32.totalorder %s2109_s23, %s1543_s27  ;;  %p1551_p1 = scmp.lt.s32.totalorder %s1549_s16, %s1543_s27 }
 0x147   : > { %v861_v3 = vadd.f32 %v839_v53, %v805_v60  ;;  %792 = vst.msk [vmem:[#allocation2 + $0x20] sm:$0xff] %vm334_vm0, %v784_v57  ;;  %793 = vst.msk [vmem:[#allocation2 + $0x28] sm:$0xff] %vm334_vm0, %v785_v58 }
 0x148   : > { %v766_v4 = vld [vmem:[#allocation2 + $0x30] sm:$0xff]  ;;  %v767_v5 = vld [vmem:[#allocation2 + $0x38] sm:$0xff]  ;;  %p1545_p12 = pnand %p1544_p11, %p1701_p5  ;;  %p1552_p2 = por %p1551_p1, %p1550_p0 }
 0x149   : > { %869 = vst.msk [vmem:[#allocation2 + $0x8] sm:$0xff] %vm334_vm0, %v861_v3  ;;  %v786_v46 = vadd.f32 %v778_v59, %v766_v4  ;;  %v787_v63 = vadd.f32 %v779_v33, %v767_v5 }
 0x14a   : > { %v806_v62 = vld [vmem:[#allocation2 + $0x10] sm:$0xff]  ;;  %v807_v6 = vld [vmem:[#allocation2 + $0x18] sm:$0xff]  ;;  %v845_v11 = vpop.permute.xlu1 %844  ;;  %v847_v12 = vpop.permute.xlu0 %846  ;;  %p1546_p13 = pneg %p1545_p12 }
 0x14b   : > { %v862_v7 = vadd.f32 %v841_v61, %v806_v62  ;;  %v863_v8 = vadd.f32 %v843_v0, %v807_v6  ;;  %794 = vst.msk [vmem:[#allocation2 + $0x30] sm:$0xff] %vm334_vm0, %v786_v46  ;;  %795 = vst.msk [vmem:[#allocation2 + $0x38] sm:$0xff] %vm334_vm0, %v787_v63 }
 0x14c   : > { %v884_v9 = vld [vmem:[#allocation2] sm:$0xff]  ;;  %p1553_p3 = pnand %p1552_p2, %p1546_p13 }
 0x14d   : > { %v904_v15 = vadd.f32 %v896_v41, %v884_v9  ;;  %870 = vst.msk [vmem:[#allocation2 + $0x10] sm:$0xff] %vm334_vm0, %v862_v7  ;;  %871 = vst.msk [vmem:[#allocation2 + $0x18] sm:$0xff] %vm334_vm0, %v863_v8 }
 0x14e   : > { %v808_v18 = vld [vmem:[#allocation2 + $0x20] sm:$0xff]  ;;  %v809_v19 = vld [vmem:[#allocation2 + $0x28] sm:$0xff]  ;;  %v849_v21 = vpop.permute.xlu1 %848  ;;  %v851_v16 = vpop.permute.xlu0 %850 }
 0x14f   : > { %912 = vst.msk [vmem:[#allocation2] sm:$0xff] %vm334_vm0, %v904_v15  ;;  %v864_v2 = vadd.f32 %v845_v11, %v808_v18  ;;  %v865_v20 = vadd.f32 %v847_v12, %v809_v19 }
 0x150   : > { %v885_v23 = vld [vmem:[#allocation2 + $0x8] sm:$0xff] }
 0x151   : > { %v905_v26 = vadd.f32 %v897_v17, %v885_v23  ;;  %872 = vst.msk [vmem:[#allocation2 + $0x20] sm:$0xff] %vm334_vm0, %v864_v2  ;;  %873 = vst.msk [vmem:[#allocation2 + $0x28] sm:$0xff] %vm334_vm0, %v865_v20 }
 0x152   : > { %v810_v10 = vld [vmem:[#allocation2 + $0x30] sm:$0xff]  ;;  %v811_v35 = vld [vmem:[#allocation2 + $0x38] sm:$0xff] }
 0x153   : > { %913 = vst.msk [vmem:[#allocation2 + $0x8] sm:$0xff] %vm334_vm0, %v905_v26  ;;  %v866_v36 = vadd.f32 %v849_v21, %v810_v10  ;;  %v867_v37 = vadd.f32 %v851_v16, %v811_v35 }
 0x154   : > { %v886_v38 = vld [vmem:[#allocation2 + $0x10] sm:$0xff]  ;;  %v887_v39 = vld [vmem:[#allocation2 + $0x18] sm:$0xff] }
 0x155   : > { %v906_v27 = vadd.f32 %v898_v29, %v886_v38  ;;  %v907_v24 = vadd.f32 %v899_v30, %v887_v39  ;;  %874 = vst.msk [vmem:[#allocation2 + $0x30] sm:$0xff] %vm334_vm0, %v866_v36  ;;  %875 = vst.msk [vmem:[#allocation2 + $0x38] sm:$0xff] %vm334_vm0, %v867_v37 }
 0x156   : > { %v920_v45 = vld [vmem:[#allocation2] sm:$0xff] }
 0x157   : > { %914 = vst.msk [vmem:[#allocation2 + $0x10] sm:$0xff] %vm334_vm0, %v906_v27  ;;  %915 = vst.msk [vmem:[#allocation2 + $0x18] sm:$0xff] %vm334_vm0, %v907_v24  ;;  %v935_v47 = vadd.f32 %v1437_v22, %v920_v45 }
 0x158   : > { %v888_v48 = vld [vmem:[#allocation2 + $0x20] sm:$0xff]  ;;  %v889_v49 = vld [vmem:[#allocation2 + $0x28] sm:$0xff] }
 0x159   : > { %v908_v28 = vadd.f32 %v900_v42, %v888_v48  ;;  %v909_v25 = vadd.f32 %v901_v43, %v889_v49  ;;  %v943_v32 = vadd.f32 3.0, %v935_v47 }
 0x15a   : > { %v921_v51 = vld [vmem:[#allocation2 + $0x8] sm:$0xff] }
 0x15b   : > { %916 = vst.msk [vmem:[#allocation2 + $0x20] sm:$0xff] %vm334_vm0, %v908_v28  ;;  %917 = vst.msk [vmem:[#allocation2 + $0x28] sm:$0xff] %vm334_vm0, %v909_v25  ;;  %v936_v52 = vadd.f32 %v1437_v22, %v921_v51  ;;  %v951_v53 = vmax.f32 %v943_v32, 0.0 }
 0x15c   : > { %v890_v54 = vld [vmem:[#allocation2 + $0x30] sm:$0xff]  ;;  %v891_v55 = vld [vmem:[#allocation2 + $0x38] sm:$0xff] }
 0x15d   : > { %v910_v56 = vadd.f32 %v902_v50, %v890_v54  ;;  %v911_v57 = vadd.f32 %v903_v31, %v891_v55  ;;  %v944_v58 = vadd.f32 3.0, %v936_v52  ;;  %v959_v34 = vmin.f32 %v951_v53, 6.0 }
 0x15e   : > { %v922_v59 = vld [vmem:[#allocation2 + $0x10] sm:$0xff]  ;;  %v923_v33 = vld [vmem:[#allocation2 + $0x18] sm:$0xff] }
 0x15f   : > { %918 = vst.msk [vmem:[#allocation2 + $0x30] sm:$0xff] %vm334_vm0, %v910_v56  ;;  %919 = vst.msk [vmem:[#allocation2 + $0x38] sm:$0xff] %vm334_vm0, %v911_v57  ;;  %v937_v40 = vadd.f32 %v1437_v22, %v922_v59  ;;  %v938_v60 = vadd.f32 %v1437_v22, %v923_v33  ;;  %v952_v61 = vmax.f32 %v944_v58, 0.0  ;;  %v967_v46 = vmul.f32 %v959_v34, %v935_v47 }
 0x161   : > { %v945_v0 = vadd.f32 3.0, %v937_v40  ;;  %v946_v3 = vadd.f32 3.0, %v938_v60  ;;  %v960_v4 = vmin.f32 %v952_v61, 6.0  ;;  %v2034_v19 = vmul.f32 0.16666667, %v967_v46 }
 0x162   : > { %v924_v5 = vld [vmem:[#allocation2 + $0x20] sm:$0xff]  ;;  %v925_v41 = vld [vmem:[#allocation2 + $0x28] sm:$0xff] }
 0x163   : > { %v939_v63 = vadd.f32 %v1437_v22, %v924_v5  ;;  %v940_v62 = vadd.f32 %v1437_v22, %v925_v41  ;;  %v953_v6 = vmax.f32 %v945_v0, 0.0  ;;  %v954_v7 = vmax.f32 %v946_v3, 0.0  ;;  %v1085_v41 = vld [vmem:[%s2162_s5] sm:$0xff] }
 0x164   : > { %v968_v8 = vmul.f32 %v960_v4, %v936_v52  ;;  %v983_v27 = vsel %vm334_vm0, %v2034_v19, 0.0  ;;  %v1010_v46 = vld [vmem:[%s2161_s4] sm:$0x1] }
 0x165   : > { %v947_v9 = vadd.f32 3.0, %v939_v63  ;;  %v948_v11 = vadd.f32 3.0, %v940_v62  ;;  %v961_v12 = vmin.f32 %v953_v6, 6.0  ;;  %v962_v15 = vmin.f32 %v954_v7, 6.0 }
 0x166   : > { %v926_v17 = vld [vmem:[#allocation2 + $0x30] sm:$0xff]  ;;  %v927_v18 = vld [vmem:[#allocation2 + $0x38] sm:$0xff]  ;;  %v2036_v2 = vmul.f32 0.16666667, %v968_v8  ;;  %v1541_v8 = vld [vmem:[%s2164_s7 + $0x8] sm:$0xff]  }
 0x167   : > { %v941_v20 = vadd.f32 %v1437_v22, %v926_v17  ;;  %v942_v23 = vadd.f32 %v1437_v22, %v927_v18  ;;  %v955_v26 = vmax.f32 %v947_v9, 0.0  ;;  %v956_v29 = vmax.f32 %v948_v11, 0.0  ;;  %1482 = vmatprep.subr.bf16.mxu1 %v1541_v8  ;;  %v1086_v9 = vld [vmem:[%s2163_s6] sm:$0x1] }
 0x168   : > { %v969_v30 = vmul.f32 %v961_v12, %v937_v40  ;;  %v970_v21 = vmul.f32 %v962_v15, %v938_v60  ;;  %v984_v10 = vsel %vm334_vm0, %v2036_v2, 0.0  ;;  %1483 = vmatpush3.bf16.msra.mxu1 %v1541_v8 }
 0x169   : > { %v949_v16 = vadd.f32 3.0, %v941_v20  ;;  %v950_v35 = vadd.f32 3.0, %v942_v23  ;;  %v963_v36 = vmin.f32 %v955_v26, 6.0  ;;  %v964_v37 = vmin.f32 %v956_v29, 6.0 }
 0x16a   : > { %v2040_v38 = vmul.f32 0.16666667, %v969_v30  ;;  %v2042_v39 = vmul.f32 0.16666667, %v970_v21  ;;  %v985_v44 = vadd.f32 %v984_v10, %v983_v27 }
 0x16b   : > { %v957_v24 = vmax.f32 %v949_v16, 0.0  ;;  %v958_v22 = vmax.f32 %v950_v35, 0.0  ;;  %v971_v42 = vmul.f32 %v963_v36, %v939_v63  ;;  %v972_v43 = vmul.f32 %v964_v37, %v940_v62 }
 0x16c   : > { %v986_v45 = vsel %vm334_vm0, %v2040_v38, 0.0  ;;  %v988_v28 = vsel %vm334_vm0, %v2042_v39, 0.0 }
 0x16d   : > { %v965_v47 = vmin.f32 %v957_v24, 6.0  ;;  %v966_v48 = vmin.f32 %v958_v22, 6.0  ;;  %v979_v49 = vmul.f32 0.16666667, %v971_v42  ;;  %v987_v50 = vadd.f32 %v986_v45, %v985_v44 }
 0x16e   : > { %v980_v32 = vmul.f32 0.16666667, %v972_v43 }
 0x16f   : > { %v973_v25 = vmul.f32 %v965_v47, %v941_v20  ;;  %v974_v31 = vmul.f32 %v966_v48, %v942_v23  ;;  %v990_v51 = vsel %vm334_vm0, %v979_v49, 0.0  ;;  %v989_v52 = vadd.f32 %v988_v28, %v987_v50 }
 0x170   : > { %v992_v56 = vsel %vm334_vm0, %v980_v32, 0.0 }
 0x171   : > { %v981_v53 = vmul.f32 0.16666667, %v973_v25  ;;  %v991_v54 = vadd.f32 %v990_v51, %v989_v52  ;;  %v982_v55 = vmul.f32 0.16666667, %v974_v31 }
 0x173   : > { %v994_v57 = vsel %vm334_vm0, %v981_v53, 0.0  ;;  %v993_v58 = vadd.f32 %v992_v56, %v991_v54  ;;  %v996_v33 = vsel %vm334_vm0, %v982_v55, 0.0 }
 0x175   : > { %v995_v59 = vadd.f32 %v994_v57, %v993_v58 }
 0x177   : > { %v997_v34 = vadd.f32 %v996_v33, %v995_v59 }
 0x179   : > { %v998_v40 = vrot.slane %v997_v34, 4 }
 0x17b   : > { %v999_v60 = vadd.f32 %v998_v40, %v997_v34 }
 0x17d   : > { %v1000_v61 = vrot.slane %v999_v60, 2 }
 0x17f   : > { %v1001_v0 = vadd.f32 %v1000_v61, %v999_v60 }
 0x181   : > { %v1002_v3 = vrot.slane %v1001_v0, 1 }
 0x183   : > { %v1003_v4 = vadd.f32 %v1002_v3, %v1001_v0 }
 0x185   : > { %v1005_v5 = vmul.f32 0.015625, %v1003_v4 }
 0x187   : > { %1475 = vmatmul.mubr.msk.f32.vlgmr.msra.gmra.mxu0 %vm334_vm0, %v1005_v5 }
 0x188   : > { %1479 = vmatprep.mubr.msk.f32.mxu0 %vm1609_vm1, %v1608_v13  ;;  %1478 = vmatpush3.msra.mxu0 %v1085_v41  ;;  %v1542_v13 = vld [vmem:[%s2164_s7] sm:$0xff]  }
 0x189   : > { %1484 = vmatprep.subr.bf16.mxu1 %v1542_v13 }
 0x18a   : > { %1485 = vmatpush3.bf16.msra.mxu1 %v1542_v13 }
 0x247   : > { %v1080_v63 = vpop.f32.mrf.mxu0 }
 0x248   : > { %v1081_v62 = vadd.f32 %v1080_v63, %v1010_v46 }
 0x249   : > { %v1476_v6 = vpop.f32.mrf.mxu0 }
 0x24a   : > { %v1084_v7 = vmax.f32 %v1081_v62, 0.0 }
 0x24c   : > { %1480 = vmatmul.mubr.msk.f32.vlgmr.msra.gmra.mxu0 %vm1087_vm2, %v1084_v7 }
 0x30c   : > { %v1157_v11 = vpop.f32.mrf.mxu0 }
 0x30d   : > { %v1158_v12 = vadd.f32 %v1157_v11, %v1086_v9 }
 0x30e   : > { %v1481_v15 = vpop.f32.mrf.mxu0 }
 0x30f   : > { %v1161_v17 = vadd.f32 3.0, %v1158_v12 }
 0x311   : > { %v1162_v18 = vmax.f32 %v1161_v17, 0.0 }
 0x313   : > { %v1163_v20 = vmin.f32 %v1162_v18, 6.0 }
 0x315   : > { %v1164_v23 = vmul.f32 0.16666667, %v1163_v20 }
 0x317   : > { %v1168_v26 = vrot.slane %v1164_v23, %v361_v14 }
 0x319   : > { %v1169_v29 = vmul.f32 %v1168_v26, %v2034_v19  ;;  %v1170_v30 = vmul.f32 %v1168_v26, %v2036_v2  ;;  %v1171_v21 = vmul.f32 %v1168_v26, %v2040_v38  ;;  %v1172_v10 = vmul.f32 %v1168_v26, %v2042_v39  ;;  %v1440_v2 = vld [vmem:[%s2165_s8] ss:$0 sm:$0xff] }
 0x31a   : > { %v1173_v16 = vmul.f32 %v1168_v26, %v979_v49  ;;  %v1174_v35 = vmul.f32 %v1168_v26, %v980_v32  ;;  %v1175_v1 = vmul.f32 %v1168_v26, %v981_v53  ;;  %v1176_v14 = vmul.f32 %v1168_v26, %v982_v55 }
 0x31b   : > { %v1177_v36 = vpack.c.bf16 %v1170_v30, %v1169_v29  ;;  %v1178_v37 = vpack.c.bf16 %v1172_v10, %v1171_v21 }
 0x31c   : > { %v1179_v27 = vpack.c.bf16 %v1174_v35, %v1173_v16  ;;  %v1180_v19 = vpack.c.bf16 %v1176_v14, %v1175_v1 }
 0x31d   : > { %1486 = vmatprep.mubr.msk.bf16.mxu1 %vm334_vm0, %v1177_v36 }
 0x31e   : > { %1487 = vmatmul.mubr.msk.bf16.vlgmr.msra.gmra.mxu1 %vm334_vm0, %v1178_v37 }
 0x31f   : > { %1490 = vmatprep.mubr.msk.bf16.mxu1 %vm334_vm0, %v1179_v27 }
 0x326   : > { %1491 = vmatmul.mubr.msk.bf16.gmra.mxu1 %vm334_vm0, %v1180_v19 }
 0x3de   : > { %v1488_v38 = vpop.f32.mrf.mxu1 }
 0x3df   : > { %v1259_v39 = vadd.f32 %v1488_v38, %v1440_v2 }
 0x3e0   : > { %v1250_v24 = vpop.f32.mrf.mxu1 }
 0x3e1   : > { %v1283_v22 = vadd.f32 3.0, %v1259_v39  ;;  %v1251_v42 = vadd.f32 %v1440_v2, %v1250_v24 }
 0x3e2   : > { %v1489_v43 = vpop.f32.mrf.mxu1 }
 0x3e3   : > { %v1291_v44 = vmax.f32 %v1283_v22, 0.0  ;;  %v1281_v45 = vadd.f32 3.0, %v1251_v42  ;;  %v1262_v47 = vadd.f32 %v1489_v43, %v1440_v2 }
 0x3e4   : > { %v1253_v48 = vpop.f32.mrf.mxu1 }
 0x3e5   : > { %v1299_v49 = vmin.f32 %v1291_v44, 6.0  ;;  %v1289_v50 = vmax.f32 %v1281_v45, 0.0  ;;  %v1284_v28 = vadd.f32 3.0, %v1262_v47  ;;  %v1254_v25 = vadd.f32 %v1440_v2, %v1253_v48 }
 0x3e6   : > { %v1492_v31 = vpop.f32.mrf.mxu1 }
 0x3e7   : > { %v1307_v32 = vmul.f32 %v1299_v49, %v1259_v39  ;;  %v1297_v51 = vmin.f32 %v1289_v50, 6.0  ;;  %v1292_v52 = vmax.f32 %v1284_v28, 0.0  ;;  %v1282_v53 = vadd.f32 3.0, %v1254_v25 }
 0x3e8   : > { %v1275_v54 = vadd.f32 %v1492_v31, %v1440_v2  ;;  %v1266_v55 = vpop.f32.mrf.mxu1 }
 0x3e9   : > { %v1315_v56 = vmul.f32 0.16666667, %v1307_v32  ;;  %v1305_v57 = vmul.f32 %v1297_v51, %v1251_v42  ;;  %v1300_v58 = vmin.f32 %v1292_v52, 6.0  ;;  %v1290_v59 = vmax.f32 %v1282_v53, 0.0 }
 0x3ea   : > { %v1287_v33 = vadd.f32 3.0, %v1275_v54  ;;  %v1267_v34 = vadd.f32 %v1440_v2, %v1266_v55  ;;  %v1493_v40 = vpop.f32.mrf.mxu1 }
 0x3eb   : > { %1324 = vst.msk [vmem:[%s2088_s21 + $0x10] sm:$0xff] %vm1321_vm3, %v1315_v56  ;;  %v1313_v60 = vmul.f32 0.16666667, %v1305_v57  ;;  %v1308_v61 = vmul.f32 %v1300_v58, %v1262_v47  ;;  %v1298_v0 = vmin.f32 %v1290_v59, 6.0  ;;  %v1278_v3 = vadd.f32 %v1493_v40, %v1440_v2 }
 0x3ec   : > { %v1295_v4 = vmax.f32 %v1287_v33, 0.0  ;;  %v1285_v5 = vadd.f32 3.0, %v1267_v34  ;;  %v1269_v41 = vpop.f32.mrf.mxu1 }
 0x3ed   : > { %1322 = vst.msk [vmem:[%s2088_s21] sm:$0xff] %vm1321_vm3, %v1313_v60  ;;  %v1316_v46 = vmul.f32 0.16666667, %v1308_v61  ;;  %v1306_v63 = vmul.f32 %v1298_v0, %v1254_v25  ;;  %v1288_v62 = vadd.f32 3.0, %v1278_v3  ;;  %v1270_v6 = vadd.f32 %v1440_v2, %v1269_v41 }
 0x3ee   : > { %v1303_v7 = vmin.f32 %v1295_v4, 6.0  ;;  %v1293_v8 = vmax.f32 %v1285_v5, 0.0 }
 0x3ef   : > { %1325 = vst.msk [vmem:[%s2088_s21 + $0x18] sm:$0xff] %vm1321_vm3, %v1316_v46  ;;  %v1314_v13 = vmul.f32 0.16666667, %v1306_v63  ;;  %v1296_v9 = vmax.f32 %v1288_v62, 0.0  ;;  %v1286_v11 = vadd.f32 3.0, %v1270_v6 }
 0x3f0   : > { %v1311_v12 = vmul.f32 %v1303_v7, %v1275_v54  ;;  %v1301_v15 = vmin.f32 %v1293_v8, 6.0 }
 0x3f1   : > { %1323 = vst.msk [vmem:[%s2088_s21 + $0x8] sm:$0xff] %vm1321_vm3, %v1314_v13  ;;  %v1304_v17 = vmin.f32 %v1296_v9, 6.0  ;;  %v1294_v18 = vmax.f32 %v1286_v11, 0.0 }
 0x3f2   : > { %v1319_v20 = vmul.f32 0.16666667, %v1311_v12  ;;  %v1309_v23 = vmul.f32 %v1301_v15, %v1267_v34 }
 0x3f3   : > { %v1312_v26 = vmul.f32 %v1304_v17, %v1278_v3  ;;  %v1302_v29 = vmin.f32 %v1294_v18, 6.0 }
 0x3f4   : > { %1328 = vst.msk [vmem:[%s2088_s21 + $0x30] sm:$0xff] %vm1321_vm3, %v1319_v20  ;;  %v1317_v30 = vmul.f32 0.16666667, %v1309_v23 }
 0x3f5   : > { %v1320_v21 = vmul.f32 0.16666667, %v1312_v26  ;;  %v1310_v10 = vmul.f32 %v1302_v29, %v1270_v6 }
 0x3f6   : > { %1326 = vst.msk [vmem:[%s2088_s21 + $0x20] sm:$0xff] %vm1321_vm3, %v1317_v30 }
 0x3f7   : > { %1329 = vst.msk [vmem:[%s2088_s21 + $0x38] sm:$0xff] %vm1321_vm3, %v1320_v21  ;;  %v1318_v16 = vmul.f32 0.16666667, %v1310_v10 }
 0x3f9   : > { %1327 = vst.msk [vmem:[%s2088_s21 + $0x28] sm:$0xff] %vm1321_vm3, %v1318_v16 }
 0x3fa   : > { %1556 = shalt.err (!%p1553_p3)
}
 0x3fb   : > { %s1557_s14 = scalar_lea.hbm %s2107_s26, 1024  ;;  %s1561_s22 = scalar_lea.hbm %s2166_s9, 2048 }
 0x3fc   : > { %p1558_p4 = scmp.ne.s32.totalorder %s2107_s26, %s1557_s14  ;;  %p1562_p9 = scmp.lt.s32.totalorder %s2107_s26, %s2166_s9 }
 0x3fd   : > { %p1563_p10 = scmp.lt.s32.totalorder %s1561_s22, %s1557_s14 }
 0x3fe   : > { %p1559_p7 = pnand %p1558_p4, %p1701_p5 }
 0x3ff   : > { %p1564_p11 = por %p1563_p10, %p1562_p9 }
 0x400   : > { %p1560_p8 = pneg %p1559_p7 }
 0x402   : > { %p1565_p12 = pnand %p1564_p11, %p1560_p8 }
 0x404   : > { %1568 = shalt.err (!%p1565_p12)
}
 0x405   : > { %s1611_s27 = smov 128   ;;  %s1612_s28 = smov 8  }
 0x406   : > { %1495 = dma.vmem_to_hbm [thread:$0]  (%p1701_p5), %s2109_s23, 1024, %s2107_s26, %s2117_s13, %s1611_s27, %s1611_s27, %s1612_s28  }
 0x407 PF: > { %p1501_p13 = scmp.ge.s32.totalorder %s1603_s12, 2  ;;  %s1359_s29 = sand.u32 1, %s1591_s30  }
 0x408   : > { %s1360_s16 = scalar_lea.sflag [#allocation4], %s1359_s29 }
 0x409   : > { %p1498_p0 = pnand %p1501_p13, %p1705_p6 }
 0x40b   : > { %p1499_p1 = pneg %p1498_p0 }
 0x40d   : > { %1586 = dma.done.wait (%p1499_p1), %s1360_s16, 1024  }
 0x40e   : > { %1588 = vsyncadd (%p1499_p1), %s1360_s16, 4294966272  ;;  %p19_p2 = scmp.ge.s32.totalorder %s1688_s15, 4   ;;  %s2169_s30 = smov %s1595_s10 }
 0x40f   : > { %s2170_s10 = smov %s1599_s11  ;;  %s2171_s11 = smov %s1699_s18 }
 0x410   : > { %s2172_s12 = smov %s1688_s15  ;;  %21 = sbr.rel (!%p19_p2) target bundleno = 3 (0x3), region = 92 }
 0x415   :  { %1365 = vsyncpa [#allocation4], 1 }
 0x416   :  { %1367 = vsyncpa [#allocation4 + $0x1], 1 }

</bundles_post_ra>
